<compile_context>
chip_gen: v5e
topology: v5e:2x2
jax: 0.10.0
libtpu: 0.0.40
codegen_flags: <defaults>
</compile_context>

<pallas_src>
import jax
import jax.numpy as jnp
from jax.experimental import pallas as pl
from jax.experimental.pallas import tpu as pltpu

LN_EPS = 1e-5   # PyTorch nn.LayerNorm default
PACK = 8        # batch rows packed per kernel row (-> 384 = 3*128 dense lanes)


# ---------------------------------------------------------------------------
# Kernel: one fused MLP over a (TR, PACK*24) tile -> (TR, PACK*48) tile.
# ---------------------------------------------------------------------------
def walker_encoder_kernel(x_ref, w1_ref, w2_ref, m_ref, slab_ref, out_ref):
    x = x_ref[...]                         # (TR, PACK*24)  f32 or bf16
    slab = slab_ref[...]                   # (4, PACK*48)   f32
    b1, b2, gamma, beta = slab[0:1], slab[1:2], slab[2:3], slab[3:4]

    # Linear -> ReLU -> Linear (block-diagonal fused across branches & pack).
    h = jnp.dot(x, w1_ref[...], preferred_element_type=jnp.float32) + b1
    h = jnp.maximum(h, 0.0)
    y = jnp.dot(h, w2_ref[...], preferred_element_type=jnp.float32) + b2

    # Per-segment LayerNorm via the block-diagonal averaging matrix M:
    #   (y @ M) broadcasts each segment's mean back to every lane of that
    #   segment; same for the (biased) variance. Matches nn.LayerNorm exactly.
    m = m_ref[...]
    mu = jnp.dot(y, m, preferred_element_type=jnp.float32)
    d = y - mu
    var = jnp.dot(d * d, m, preferred_element_type=jnp.float32)
    y_hat = d * jax.lax.rsqrt(var + LN_EPS)

    out_ref[...] = (y_hat * gamma + beta).astype(out_ref.dtype)


# ---------------------------------------------------------------------------
# Parameters
# ---------------------------------------------------------------------------
def init_params(key):
    """Deterministic synthetic parameters (same shapes as the torch module,
    weights stored pre-transposed as (in, out))."""
    def linear(key, fan_in, fan_out):
        kw, kb = jax.random.split(key)
        bound = 1.0 / jnp.sqrt(fan_in)
        w = jax.random.uniform(kw, (fan_in, fan_out), jnp.float32, -bound, bound)
        b = jax.random.uniform(kb, (1, fan_out), jnp.float32, -bound, bound)
        return w, b

    keys = jax.random.split(key, 6)
    params = {}
    for name, (din, dhid), (k1, k2) in [
        ("orientation", (14, 28), (keys[0], keys[1])),
        ("velocity", (9, 18), (keys[2], keys[3])),
        ("height", (1, 2), (keys[4], keys[5])),
    ]:
        w1, b1 = linear(k1, din, dhid)
        w2, b2 = linear(k2, dhid, dhid)
        gamma = jnp.ones((1, dhid), jnp.float32)
        beta = jnp.zeros((1, dhid), jnp.float32)
        params[name] = (w1, b1, w2, b2, gamma, beta)
    return params


def pack_params(params, pack=PACK):
    """Fuse the 3 branches into block-diagonal matrices and replicate them
    `pack` times so the kernel operates on lane-dense (pack*48)-wide tiles."""
    wo1, bo1, wo2, bo2, go, beo = params["orientation"]
    wv1, bv1, wv2, bv2, gv, bev = params["velocity"]
    wh1, bh1, wh2, bh2, gh, beh = params["height"]

    w1 = jax.scipy.linalg.block_diag(wo1, wv1, wh1)        # (24, 48)
    w2 = jax.scipy.linalg.block_diag(wo2, wv2, wh2)        # (48, 48)
    widths = (wo2.shape[1], wv2.shape[1], wh2.shape[1])    # 28, 18, 2
    m = jax.scipy.linalg.block_diag(
        *[jnp.full((w, w), 1.0 / w, jnp.float32) for w in widths])  # (48, 48)

    eye = jnp.eye(pack, dtype=jnp.float32)
    w1_big = jnp.kron(eye, w1)                             # (192, 384)
    w2_big = jnp.kron(eye, w2)                             # (384, 384)
    m_big = jnp.kron(eye, m)                               # (384, 384)

    def row(*parts):                                       # -> (1, pack*48)
        return jnp.tile(jnp.concatenate(parts, axis=-1), (1, pack))

    slab = jnp.concatenate(
        [row(bo1, bv1, bh1), row(bo2, bv2, bh2),
         row(go, gv, gh), row(beo, bev, beh)], axis=0)     # (4, 384)

    return {"w1": w1_big, "w2": w2_big, "m": m_big, "slab": slab,
            "d_in": w1.shape[0], "d_out": w2.shape[1], "pack": pack}


# ---------------------------------------------------------------------------
# Wrapper
# ---------------------------------------------------------------------------
def walker_encoder_forward(x, packed, *, tile_rows=512, stream_bf16=False):
    """tile_rows = packed rows per grid step (1 packed row = PACK batch rows)."""
    ori = x["orientations"].astype(jnp.float32)
    vel = x["velocity"].astype(jnp.float32)
    hgt = x["height"].astype(jnp.float32)
    if hgt.ndim == 1:
        hgt = hgt[:, None]

    x_cat = jnp.concatenate([ori, vel, hgt], axis=-1)      # (B, 24)
    B, d_in = x_cat.shape
    d_out = packed["d_out"]
    pack = packed["pack"]

    R = pl.cdiv(B, pack)                                   # packed rows needed
    if R <= tile_rows:
        TR = R                                             # single full block
    else:
        TR = max(8, (tile_rows // 8) * 8)                  # sublane-aligned tile
    Rp = pl.cdiv(R, TR) * TR
    Bp = Rp * pack
    if Bp != B:
        x_cat = jnp.pad(x_cat, ((0, Bp - B), (0, 0)))
    x_pk = x_cat.reshape(Rp, pack * d_in)                  # (Rp, 192) lane-dense-ish

    w1 = packed["w1"]
    if stream_bf16:
        # Halve HBM read traffic of the dominant activation stream (v6e/v7x);
        # only the MXU sees bf16, all VPU/LayerNorm math stays f32 (v5e-safe).
        x_pk = x_pk.astype(jnp.bfloat16)
        w1 = w1.astype(jnp.bfloat16)

    const = lambda i: (0, 0)                               # weights stay resident
    out = pl.pallas_call(
        walker_encoder_kernel,
        out_shape=jax.ShapeDtypeStruct((Rp, pack * d_out), jnp.float32),
        grid=(Rp // TR,),
        in_specs=[
            pl.BlockSpec((TR, pack * d_in), lambda i: (i, 0)),
            pl.BlockSpec(w1.shape, const),
            pl.BlockSpec(packed["w2"].shape, const),
            pl.BlockSpec(packed["m"].shape, const),
            pl.BlockSpec(packed["slab"].shape, const),
        ],
        out_specs=pl.BlockSpec((TR, pack * d_out), lambda i: (i, 0)),
        compiler_params=pltpu.CompilerParams(
            dimension_semantics=("parallel",)),
    )(x_pk, w1, packed["w2"], packed["m"], packed["slab"])

    # Contiguous row-major reshape back to (B, 48); padding rows sliced off.
    return out.reshape(Bp, d_out)[:B]


# ---------------------------------------------------------------------------
# Pure-JAX reference (mirrors the torch module, per-branch, for verification)
# ---------------------------------------------------------------------------
def _reference_forward(x, params):
    def branch(inp, p):
        w1, b1, w2, b2, g, bt = p
        h = jnp.maximum(inp @ w1 + b1, 0.0)
        y = h @ w2 + b2
        mu = jnp.mean(y, axis=-1, keepdims=True)
        var = jnp.mean((y - mu) ** 2, axis=-1, keepdims=True)
        return (y - mu) / jnp.sqrt(var + LN_EPS) * g + bt

    hgt = x["height"].astype(jnp.float32)
    if hgt.ndim == 1:
        hgt = hgt[:, None]
    return jnp.concatenate(
        [branch(x["orientations"].astype(jnp.float32), params["orientation"]),
         branch(x["velocity"].astype(jnp.float32), params["velocity"]),
         branch(hgt, params["height"])], axis=-1)


if __name__ == "__main__":
    key = jax.random.PRNGKey(0)
    k_params, k_o, k_v, k_h = jax.random.split(key, 4)
    params = init_params(k_params)
    packed = pack_params(params)

    def make_inputs(B):
        return {
            "orientations": jax.random.normal(k_o, (B, 14), jnp.float32),
            "velocity": jax.random.normal(k_v, (B, 9), jnp.float32),
            "height": jax.random.normal(k_h, (B,), jnp.float32),  # 1-D path
        }

    # Case 1: tiny batch (non-multiple of 8), single tile, f32.
    x1 = make_inputs(10)
    out1 = jax.block_until_ready(walker_encoder_forward(x1, packed))
    ref1 = _reference_forward(x1, params)
    assert out1.shape == (10, 48), out1.shape
    assert jnp.allclose(out1, ref1, atol=1e-4, rtol=1e-4), \
        float(jnp.max(jnp.abs(out1 - ref1)))

    # Case 2: multi-tile grid (exercises padding + pipelined batch grid), f32.
    x2 = make_inputs(300)
    out2 = jax.block_until_ready(walker_encoder_forward(x2, packed, tile_rows=16))
    ref2 = _reference_forward(x2, params)
    assert out2.shape == (300, 48), out2.shape
    assert jnp.allclose(out2, ref2, atol=1e-4, rtol=1e-4), \
        float(jnp.max(jnp.abs(out2 - ref2)))

    # Case 3: bf16-streamed inputs (HBM-traffic optimization for v6e/v7x).
    out3 = jax.block_until_ready(
        walker_encoder_forward(x2, packed, tile_rows=16, stream_bf16=True))
    assert out3.shape == (300, 48), out3.shape
    assert bool(jnp.isfinite(out3).all())
    # Skip the width-2 height LayerNorm columns (numerically touchy under bf16).
    assert jnp.allclose(out3[:, :46], ref2[:, :46], atol=1e-1, rtol=1e-1), \
        float(jnp.max(jnp.abs(out3[:, :46] - ref2[:, :46])))

    print("KERNEL_OK")
</pallas_src>

<mosaic_0001>
module attributes {stable_mosaic.version = 11 : i64} {
  func.func @walker_encoder_kernel(%arg0: i32, %arg1: memref<2x192xf32, #tpu.memory_space<vmem>>, %arg2: memref<192x384xf32, #tpu.memory_space<vmem>>, %arg3: memref<384x384xf32, #tpu.memory_space<vmem>>, %arg4: memref<384x384xf32, #tpu.memory_space<vmem>>, %arg5: memref<4x384xf32, #tpu.memory_space<vmem>>, %arg6: memref<2x384xf32, #tpu.memory_space<vmem>>) attributes {dimension_semantics = [#tpu.dimension_semantics<parallel>], iteration_bounds = array<i64: 1>, scalar_prefetch = 0 : i64, scratch_operands = 0 : i64, tpu.core_type = #tpu.core_type<tc>, window_params = [{transform_indices = @transform_0, window_bounds = array<i64: 2, 192>}, {pipeline_mode = #tpu.pipeline_mode<synchronous>, transform_indices = @transform_1, window_bounds = array<i64: 192, 384>}, {pipeline_mode = #tpu.pipeline_mode<synchronous>, transform_indices = @transform_2, window_bounds = array<i64: 384, 384>}, {pipeline_mode = #tpu.pipeline_mode<synchronous>, transform_indices = @transform_3, window_bounds = array<i64: 384, 384>}, {pipeline_mode = #tpu.pipeline_mode<synchronous>, transform_indices = @transform_4, window_bounds = array<i64: 4, 384>}, {transform_indices = @transform_5, window_bounds = array<i64: 2, 384>}]} {
    %c0 = arith.constant 0 : index
    %c0_0 = arith.constant 0 : index
    %0 = vector.load %arg1[%c0, %c0_0] : memref<2x192xf32, #tpu.memory_space<vmem>>, vector<2x192xf32>
    %c0_1 = arith.constant 0 : index
    %c0_2 = arith.constant 0 : index
    %1 = vector.load %arg5[%c0_1, %c0_2] : memref<4x384xf32, #tpu.memory_space<vmem>>, vector<4x384xf32>
    %2 = vector.extract_strided_slice %1 {offsets = [0, 0], sizes = [1, 384], strides = [1, 1]} : vector<4x384xf32> to vector<1x384xf32>
    %3 = vector.extract_strided_slice %1 {offsets = [1, 0], sizes = [1, 384], strides = [1, 1]} : vector<4x384xf32> to vector<1x384xf32>
    %4 = vector.extract_strided_slice %1 {offsets = [2, 0], sizes = [1, 384], strides = [1, 1]} : vector<4x384xf32> to vector<1x384xf32>
    %5 = vector.extract_strided_slice %1 {offsets = [3, 0], sizes = [1, 384], strides = [1, 1]} : vector<4x384xf32> to vector<1x384xf32>
    %c0_3 = arith.constant 0 : index
    %c0_4 = arith.constant 0 : index
    %6 = vector.load %arg2[%c0_3, %c0_4] : memref<192x384xf32, #tpu.memory_space<vmem>>, vector<192x384xf32>
    %cst = arith.constant dense<0.000000e+00> : vector<2x384xf32>
    %7 = tpu.matmul %0, %6, %cst {dimension_numbers = #tpu.dot_dimension_numbers<[1], [0], [0], [1], [0, 0, 1, 1], [], []>} : vector<2x192xf32>, vector<192x384xf32>, vector<2x384xf32> -> vector<2x384xf32>
    %8 = vector.broadcast %2 : vector<1x384xf32> to vector<2x384xf32>
    %9 = arith.addf %7, %8 : vector<2x384xf32>
    %cst_5 = arith.constant 0.000000e+00 : f32
    %10 = vector.broadcast %cst_5 : f32 to vector<2x384xf32>
    %11 = arith.maximumf %9, %10 : vector<2x384xf32>
    %c0_6 = arith.constant 0 : index
    %c0_7 = arith.constant 0 : index
    %12 = vector.load %arg3[%c0_6, %c0_7] : memref<384x384xf32, #tpu.memory_space<vmem>>, vector<384x384xf32>
    %cst_8 = arith.constant dense<0.000000e+00> : vector<2x384xf32>
    %13 = tpu.matmul %11, %12, %cst_8 {dimension_numbers = #tpu.dot_dimension_numbers<[1], [0], [0], [1], [0, 0, 1, 1], [], []>} : vector<2x384xf32>, vector<384x384xf32>, vector<2x384xf32> -> vector<2x384xf32>
    %14 = vector.broadcast %3 : vector<1x384xf32> to vector<2x384xf32>
    %15 = arith.addf %13, %14 : vector<2x384xf32>
    %c0_9 = arith.constant 0 : index
    %c0_10 = arith.constant 0 : index
    %16 = vector.load %arg4[%c0_9, %c0_10] : memref<384x384xf32, #tpu.memory_space<vmem>>, vector<384x384xf32>
    %cst_11 = arith.constant dense<0.000000e+00> : vector<2x384xf32>
    %17 = tpu.matmul %15, %16, %cst_11 {dimension_numbers = #tpu.dot_dimension_numbers<[1], [0], [0], [1], [0, 0, 1, 1], [], []>} : vector<2x384xf32>, vector<384x384xf32>, vector<2x384xf32> -> vector<2x384xf32>
    %18 = arith.subf %15, %17 : vector<2x384xf32>
    %19 = arith.mulf %18, %18 : vector<2x384xf32>
    %cst_12 = arith.constant dense<0.000000e+00> : vector<2x384xf32>
    %20 = tpu.matmul %19, %16, %cst_12 {dimension_numbers = #tpu.dot_dimension_numbers<[1], [0], [0], [1], [0, 0, 1, 1], [], []>} : vector<2x384xf32>, vector<384x384xf32>, vector<2x384xf32> -> vector<2x384xf32>
    %cst_13 = arith.constant 9.99999974E-6 : f32
    %21 = vector.broadcast %cst_13 : f32 to vector<2x384xf32>
    %22 = arith.addf %20, %21 : vector<2x384xf32>
    %23 = math.rsqrt %22 : vector<2x384xf32>
    %24 = arith.mulf %18, %23 : vector<2x384xf32>
    %25 = vector.broadcast %4 : vector<1x384xf32> to vector<2x384xf32>
    %26 = arith.mulf %24, %25 : vector<2x384xf32>
    %27 = vector.broadcast %5 : vector<1x384xf32> to vector<2x384xf32>
    %28 = arith.addf %26, %27 : vector<2x384xf32>
    %c0_14 = arith.constant 0 : index
    %c0_15 = arith.constant 0 : index
    %29 = vector.load %arg6[%c0_14, %c0_15] : memref<2x384xf32, #tpu.memory_space<vmem>>, vector<2x384xf32>
    tpu.vector_store %arg6[%c0_14, %c0_15], %28 {strides = array<i32>} : memref<2x384xf32, #tpu.memory_space<vmem>>, vector<2x384xf32>,
    return
  }
  func.func @transform_0(%arg0: i32) -> (i32, i32) {
    %c0_i32 = arith.constant 0 : i32
    %c0_i32_0 = arith.constant 0 : i32
    return %arg0, %c0_i32 : i32, i32
  }
  func.func @transform_1(%arg0: i32) -> (i32, i32) {
    %c0_i32 = arith.constant 0 : i32
    %c0_i32_0 = arith.constant 0 : i32
    %c0_i32_1 = arith.constant 0 : i32
    return %c0_i32, %c0_i32_0 : i32, i32
  }
  func.func @transform_2(%arg0: i32) -> (i32, i32) {
    %c0_i32 = arith.constant 0 : i32
    %c0_i32_0 = arith.constant 0 : i32
    %c0_i32_1 = arith.constant 0 : i32
    return %c0_i32, %c0_i32_0 : i32, i32
  }
  func.func @transform_3(%arg0: i32) -> (i32, i32) {
    %c0_i32 = arith.constant 0 : i32
    %c0_i32_0 = arith.constant 0 : i32
    %c0_i32_1 = arith.constant 0 : i32
    return %c0_i32, %c0_i32_0 : i32, i32
  }
  func.func @transform_4(%arg0: i32) -> (i32, i32) {
    %c0_i32 = arith.constant 0 : i32
    %c0_i32_0 = arith.constant 0 : i32
    %c0_i32_1 = arith.constant 0 : i32
    return %c0_i32, %c0_i32_0 : i32, i32
  }
  func.func @transform_5(%arg0: i32) -> (i32, i32) {
    %c0_i32 = arith.constant 0 : i32
    %c0_i32_0 = arith.constant 0 : i32
    return %arg0, %c0_i32 : i32, i32
  }
}

</mosaic_0001>

<bundles_post_ra>
// kernel: tpu_custom_call.1
= control target key start
LH: loop header
LB: loop body
LE: loop exit
PB: predicated region body
PF: predicated region fallthrough
CT: control target
= control target key end

     0   :  { %10 = vsyncpa [#allocation3], 0  ;;  %s2106_s0 = inlined_call_operand.hbm [shape: f32[2,192], index: 0, kind: input, shape index: {}]   ;;  %s2107_s1 = inlined_call_operand.hbm [shape: f32[192,384], index: 1, kind: input, shape index: {}]   ;;  %s2108_s2 = inlined_call_operand.hbm [shape: f32[384,384], index: 2, kind: input, shape index: {}]   ;;  %s2109_s3 = inlined_call_operand.hbm [shape: f32[384,384], index: 3, kind: input, shape index: {}]   ;;  %s2110_s4 = inlined_call_operand.hbm [shape: f32[4,384], index: 4, kind: input, shape index: {}]   ;;  %s2111_s5 = inlined_call_operand.hbm [shape: f32[2,384], index: 5, kind: output, shape index: {}]  }
   0x1   :  { %11 = vsyncpa [#allocation6], 0 }
   0x2   :  { %12 = vsyncpa [#allocation9], 0  ;;  %s29_s20 = sshll.u32 %s2107_s1, 4  ;;  %s30_s20 = int_to_ptr.hbm [resolvable:$true] %s29_s20 }
   0x3   :  { %13 = vsyncpa [#allocation4], 0  ;;  %s1413_s21 = smov [#allocation5]   ;;  %s55_s25 = sshll.u32 %s2109_s3, 4  ;;  %s56_s25 = int_to_ptr.hbm [resolvable:$true] %s55_s25 }
   0x4   :  { %s31_s22 = sshll.u32 %s1413_s21, 4  ;;  %s1414_s26 = smov 384   ;;  %s32_s22 = int_to_ptr.vmem [resolvable:$true] %s31_s22 }
   0x5   :  { %s1415_s27 = smov 24   ;;  %s1416_s28 = smov [#allocation8]  }
   0x6   :  { %37 = dma.hbm_to_vmem [thread:$0]  %s30_s20, 9216, %s32_s22, [#allocation6], %s1414_s26, %s1414_s26, %s1415_s27  }
   0x7   :  { %s57_s29 = sshll.u32 %s1416_s28, 4  ;;  %s19_s7 = sshll.u32 %s2106_s0, 4  ;;  %s58_s29 = int_to_ptr.vmem [resolvable:$true] %s57_s29  ;;  %s20_s7 = int_to_ptr.hbm [resolvable:$true] %s19_s7 }
   0x8   :  { %63 = dma.hbm_to_vmem [thread:$0]  %s56_s25, 18432, %s58_s29, [#allocation9], %s1414_s26, %s1414_s26, %s1415_s27  }
   0x9   :  { %s42_s9 = sshll.u32 %s2108_s2, 4  ;;  %s1417_s10 = smov [#allocation2]   ;;  %s43_s9 = int_to_ptr.hbm [resolvable:$true] %s42_s9 }
   0xa   :  { %s21_s11 = sshll.u32 %s1417_s10, 4  ;;  %s1418_s3 = smov [#allocation7]   ;;  %s22_s11 = int_to_ptr.vmem [resolvable:$true] %s21_s11 }
   0xb   :  { %24 = dma.hbm_to_vmem [thread:$0]  %s20_s7, 64, %s22_s11, [#allocation3]  }
   0xc   :  { %s44_s12 = sshll.u32 %s1418_s3, 4  ;;  %s69_s15 = sshll.u32 %s2110_s4, 4  ;;  %s45_s12 = int_to_ptr.vmem [resolvable:$true] %s44_s12  ;;  %s70_s15 = int_to_ptr.hbm [resolvable:$true] %s69_s15 }
   0xd   :  { %50 = dma.hbm_to_vmem [thread:$0]  %s43_s9, 18432, %s45_s12, [#allocation6], %s1414_s26, %s1414_s26, %s1415_s27  }
   0xe   :  { %s1419_s0 = smov [#allocation10]  }
   0xf   :  { %s71_s16 = sshll.u32 %s1419_s0, 4  ;;  %s72_s16 = int_to_ptr.vmem [resolvable:$true] %s71_s16 }
  0x10   :  { %74 = dma.hbm_to_vmem [thread:$0]  %s70_s15, 192, %s72_s16, [#allocation9]  }
  0x11   :  { %1405 = dma.done.wait [#allocation3], 64  }
  0x12   :  { %1406 = vsyncadd [#allocation3], 4294967232 }
  0x13   :  { %1407 = dma.done.wait [#allocation6], 27648  }
  0x14   :  { %1408 = vsyncadd [#allocation6], 4294939648 }
  0x15   :  { %1409 = dma.done.wait [#allocation9], 18624  }
  0x16   :  { %1410 = vsyncadd [#allocation9], 4294948672  ;;  %v143_v0 = vld [vmem:[#allocation5 + $0x168] sm:$0xff]  ;;  %v144_v2 = vld [vmem:[#allocation5 + $0x170] sm:$0xff]  ;;  %vm186_vm0 = vcmask 523264   ;;  %vm1217_vm10 = vcmask 1041408  }
  0x17   :  { %v167_v1 = vld [vmem:[#allocation5 + $0x228] sm:$0xff]  ;;  %189 = vmatpush.msra.mxu0 %v143_v0  ;;  %v140_v3 = vld [vmem:[#allocation5 + $0x150] sm:$0xff]  ;;  %v141_v5 = vld [vmem:[#allocation5 + $0x158] sm:$0xff]  ;;  %229 = vmatpush.msra.mxu2 %v144_v2  ;;  %s1420_s2 = smov [#allocation11]   ;;  %s1230_s19 = sshll.u32 %s2111_s5, 4  ;;  %vm1219_vm11 = vcmask 1043456   ;;  %s1231_s19 = int_to_ptr.hbm [resolvable:$true] %s1230_s19 }
  0x18   :  { %217 = vmatpush.msra.mxu1 %v167_v1  ;;  %v164_v4 = vld [vmem:[#allocation5 + $0x210] sm:$0xff]  ;;  %v137_v6 = vld [vmem:[#allocation5 + $0x138] sm:$0xff]  ;;  %v138_v8 = vld [vmem:[#allocation5 + $0x140] sm:$0xff]  ;;  %s1228_s4 = sshll.u32 %s1420_s2, 4  ;;  %s1229_s4 = int_to_ptr.vmem [resolvable:$true] %s1228_s4 }
  0x19   :  { %v161_v7 = vld [vmem:[#allocation5 + $0x1f8] sm:$0xff]  ;;  %190 = vmatpush.msra.mxu0 %v140_v3  ;;  %230 = vmatpush.msra.mxu2 %v141_v5  ;;  %v134_v9 = vld [vmem:[#allocation5 + $0x120] sm:$0xff]  ;;  %v135_v11 = vld [vmem:[#allocation5 + $0x128] sm:$0xff] }
  0x1a   :  { %218 = vmatpush.msra.mxu1 %v164_v4  ;;  %v158_v10 = vld [vmem:[#allocation5 + $0x1e0] sm:$0xff]  ;;  %v131_v12 = vld [vmem:[#allocation5 + $0x108] sm:$0xff]  ;;  %v132_v14 = vld [vmem:[#allocation5 + $0x110] sm:$0xff] }
  0x1b   :  { %191 = vmatpush.msra.mxu0 %v137_v6  ;;  %231 = vmatpush.msra.mxu2 %v138_v8  ;;  %v155_v13 = vld [vmem:[#allocation5 + $0x1c8] sm:$0xff]  ;;  %v168_v15 = vld [vmem:[#allocation5 + $0x230] sm:$0xff]  ;;  %v165_v18 = vld [vmem:[#allocation5 + $0x218] sm:$0xff] }
  0x1c   :  { %219 = vmatpush.msra.mxu1 %v161_v7  ;;  %v128_v16 = vld [vmem:[#allocation5 + $0xf0] sm:$0xff]  ;;  %257 = vmatpush.msra.mxu3 %v168_v15  ;;  %v129_v19 = vld [vmem:[#allocation5 + $0xf8] sm:$0xff]  ;;  %v162_v20 = vld [vmem:[#allocation5 + $0x200] sm:$0xff] }
  0x1d   :  { %192 = vmatpush.msra.mxu0 %v134_v9  ;;  %232 = vmatpush.msra.mxu2 %v135_v11  ;;  %v152_v17 = vld [vmem:[#allocation5 + $0x1b0] sm:$0xff]  ;;  %v125_v21 = vld [vmem:[#allocation5 + $0xd8] sm:$0xff]  ;;  %v126_v23 = vld [vmem:[#allocation5 + $0xe0] sm:$0xff] }
  0x1e   :  { %220 = vmatpush.msra.mxu1 %v158_v10  ;;  %v149_v22 = vld [vmem:[#allocation5 + $0x198] sm:$0xff]  ;;  %258 = vmatpush.msra.mxu3 %v165_v18  ;;  %v159_v24 = vld [vmem:[#allocation5 + $0x1e8] sm:$0xff]  ;;  %v122_v25 = vld [vmem:[#allocation5 + $0xc0] sm:$0xff] }
  0x1f   :  { %193 = vmatpush.msra.mxu0 %v131_v12  ;;  %233 = vmatpush.msra.mxu2 %v132_v14  ;;  %v146_v26 = vld [vmem:[#allocation5 + $0x180] sm:$0xff]  ;;  %v123_v27 = vld [vmem:[#allocation5 + $0xc8] sm:$0xff]  ;;  %v145_v28 = vld [vmem:[#allocation5 + $0x178] sm:$0xff] }
  0x20   :  { %221 = vmatpush.msra.mxu1 %v155_v13  ;;  %259 = vmatpush.msra.mxu3 %v162_v20  ;;  %v119_v29 = vld [vmem:[#allocation5 + $0xa8] sm:$0xff]  ;;  %v156_v30 = vld [vmem:[#allocation5 + $0x1d0] sm:$0xff]  ;;  %v142_v32 = vld [vmem:[#allocation5 + $0x160] sm:$0xff] }
  0x21   :  { %194 = vmatpush.msra.mxu0 %v128_v16  ;;  %234 = vmatpush.msra.mxu2 %v129_v19  ;;  %v120_v31 = vld [vmem:[#allocation5 + $0xb0] sm:$0xff]  ;;  %v153_v34 = vld [vmem:[#allocation5 + $0x1b8] sm:$0xff]  ;;  %v139_v36 = vld [vmem:[#allocation5 + $0x148] sm:$0xff] }
  0x22   :  { %222 = vmatpush.msra.mxu1 %v152_v17  ;;  %260 = vmatpush.msra.mxu3 %v159_v24  ;;  %v116_v33 = vld [vmem:[#allocation5 + $0x90] sm:$0xff]  ;;  %v117_v35 = vld [vmem:[#allocation5 + $0x98] sm:$0xff]  ;;  %v150_v38 = vld [vmem:[#allocation5 + $0x1a0] sm:$0xff] }
  0x23   :  { %195 = vmatpush.msra.mxu0 %v125_v21  ;;  %235 = vmatpush.msra.mxu2 %v126_v23  ;;  %v113_v37 = vld [vmem:[#allocation5 + $0x78] sm:$0xff]  ;;  %v114_v39 = vld [vmem:[#allocation5 + $0x80] sm:$0xff]  ;;  %v136_v40 = vld [vmem:[#allocation5 + $0x130] sm:$0xff] }
  0x24   :  { %223 = vmatpush.msra.mxu1 %v149_v22  ;;  %261 = vmatpush.msra.mxu3 %v156_v30  ;;  %v95_v41 = vld [vmem:[#allocation2] sm:$0xf]  ;;  %v110_v42 = vld [vmem:[#allocation5 + $0x60] sm:$0xff]  ;;  %v147_v43 = vld [vmem:[#allocation5 + $0x188] sm:$0xff] }
  0x25   :  { %196 = vmatpush.msra.mxu0 %v122_v25  ;;  %236 = vmatpush.msra.mxu2 %v123_v27  ;;  %182 = vst [vmem:[#allocation1] ss:$4 sm:$0xff] %v95_v41  ;;  %v111_v44 = vld [vmem:[#allocation5 + $0x68] sm:$0xff]  ;;  %v133_v45 = vld [vmem:[#allocation5 + $0x118] sm:$0xff]  ;;  %v108_v48 = vld [vmem:[#allocation5 + $0x50] sm:$0xff] }
  0x26   :  { %224 = vmatpush.msra.mxu1 %v146_v26  ;;  %262 = vmatpush.msra.mxu3 %v153_v34  ;;  %v107_v46 = vld [vmem:[#allocation5 + $0x48] sm:$0xff]  ;;  %v169_v47 = vld [vmem:[#allocation5 + $0x238] sm:$0xff]  ;;  %v130_v49 = vld [vmem:[#allocation5 + $0x100] sm:$0xff] }
  0x27   :  { %197 = vmatpush.msra.mxu0 %v119_v29  ;;  %237 = vmatpush.msra.mxu2 %v120_v31  ;;  %v104_v50 = vld [vmem:[#allocation5 + $0x30] sm:$0xff]  ;;  %v166_v51 = vld [vmem:[#allocation5 + $0x220] sm:$0xff]  ;;  %v105_v52 = vld [vmem:[#allocation5 + $0x38] sm:$0xff] }
  0x28   :  { %269 = vmatpush.msrb.mxu1 %v145_v28  ;;  %263 = vmatpush.msra.mxu3 %v150_v38  ;;  %v127_v53 = vld [vmem:[#allocation5 + $0xe8] sm:$0xff]  ;;  %v101_v54 = vld [vmem:[#allocation5 + $0x18] sm:$0xff]  ;;  %v102_v56 = vld [vmem:[#allocation5 + $0x20] sm:$0xff] }
  0x29   :  { %198 = vmatpush.msra.mxu0 %v116_v33  ;;  %238 = vmatpush.msra.mxu2 %v117_v35  ;;  %v163_v55 = vld [vmem:[#allocation5 + $0x208] sm:$0xff]  ;;  %v124_v57 = vld [vmem:[#allocation5 + $0xd0] sm:$0xff]  ;;  %v98_v58 = vld [vmem:[#allocation5] sm:$0xff] }
  0x2a   :  { %270 = vmatpush.msrb.mxu1 %v142_v32  ;;  %264 = vmatpush.msra.mxu3 %v147_v43  ;;  %v99_v60 = vld [vmem:[#allocation5 + $0x8] sm:$0xff]  ;;  %v121_v62 = vld [vmem:[#allocation5 + $0xb8] sm:$0xff]  ;;  %v118_v0 = vld [vmem:[#allocation5 + $0xa0] sm:$0xff] }
  0x2b   :  { %199 = vmatpush.msra.mxu0 %v113_v37  ;;  %239 = vmatpush.msra.mxu2 %v114_v39  ;;  %v357_v63 = vld [vmem:[#allocation7 + $0x168] sm:$0xff]  ;;  %v160_v1 = vld [vmem:[#allocation5 + $0x1f0] sm:$0xff]  ;;  %v157_v5 = vld [vmem:[#allocation5 + $0x1d8] sm:$0xff] }
  0x2c   :  { %271 = vmatpush.msrb.mxu1 %v139_v36  ;;  %297 = vmatpush.msrb.mxu3 %v169_v47  ;;  %v184_v59 = vld.sshfl [vmem:[#allocation1 + $0x8] sm:$0xff pattern:$0x73625140]  ;;  %v1466_v61 = vld.sshfl [vmem:[#allocation1] sm:$0xff pattern:$0x73625140] }
  0x2d   :  { %200 = vmatpush.msra.mxu0 %v110_v42  ;;  %240 = vmatpush.msra.mxu2 %v111_v44  ;;  %v354_v2 = vld [vmem:[#allocation7 + $0x150] sm:$0xff]  ;;  %v405_v3 = vld [vmem:[#allocation7 + $0x2e8] sm:$0xff]  ;;  %v351_v6 = vld [vmem:[#allocation7 + $0x138] sm:$0xff] }
  0x2e   :  { %272 = vmatpush.msrb.mxu1 %v136_v40  ;;  %298 = vmatpush.msrb.mxu3 %v166_v51  ;;  %v115_v4 = vld [vmem:[#allocation5 + $0x88] sm:$0xff]  ;;  %v402_v7 = vld [vmem:[#allocation7 + $0x2d0] sm:$0xff]  ;;  %v154_v9 = vld [vmem:[#allocation5 + $0x1c0] sm:$0xff] }
  0x2f   :  { %201 = vmatpush.msra.mxu0 %v107_v46  ;;  %241 = vmatpush.msra.mxu2 %v108_v48  ;;  %v112_v8 = vld [vmem:[#allocation5 + $0x70] sm:$0xff]  ;;  %v348_v10 = vld [vmem:[#allocation7 + $0x120] sm:$0xff]  ;;  %v399_v11 = vld [vmem:[#allocation7 + $0x2b8] sm:$0xff] }
  0x30   :  { %273 = vmatpush.msrb.mxu1 %v133_v45  ;;  %299 = vmatpush.msrb.mxu3 %v163_v55  ;;  %v109_v12 = vld [vmem:[#allocation5 + $0x58] sm:$0xff]  ;;  %v151_v13 = vld [vmem:[#allocation5 + $0x1a8] sm:$0xff]  ;;  %v396_v15 = vld [vmem:[#allocation7 + $0x2a0] sm:$0xff] }
  0x31   :  { %202 = vmatpush.msra.mxu0 %v104_v50  ;;  %242 = vmatpush.msra.mxu2 %v105_v52  ;;  %v345_v14 = vld [vmem:[#allocation7 + $0x108] sm:$0xff]  ;;  %v106_v16 = vld [vmem:[#allocation5 + $0x40] sm:$0xff]  ;;  %v148_v17 = vld [vmem:[#allocation5 + $0x190] sm:$0xff] }
  0x32   :  { %274 = vmatpush.msrb.mxu1 %v130_v49  ;;  %1243 = vmatmul.msk.f32.vlgmr.msra.gmra.mxu3 %vm186_vm0, %v184_v59  ;;  %v342_v18 = vld [vmem:[#allocation7 + $0xf0] sm:$0xff]  ;;  %v103_v19 = vld [vmem:[#allocation5 + $0x28] sm:$0xff]  ;;  %v339_v21 = vld [vmem:[#allocation7 + $0xd8] sm:$0xff] }
  0x33   :  { %203 = vmatpush.msra.mxu0 %v101_v54  ;;  %243 = vmatpush.msra.mxu2 %v102_v56  ;;  %v393_v20 = vld [vmem:[#allocation7 + $0x288] sm:$0xff]  ;;  %v100_v23 = vld [vmem:[#allocation5 + $0x10] sm:$0xff]  ;;  %v336_v25 = vld [vmem:[#allocation7 + $0xc0] sm:$0xff] }
  0x34   :  { %275 = vmatpush.msrb.mxu1 %v127_v53  ;;  %300 = vmatpush.msrb.mxu3 %v160_v1  ;;  %v453_v22 = vld [vmem:[#allocation7 + $0x468] sm:$0xff]  ;;  %v390_v24 = vld [vmem:[#allocation7 + $0x270] sm:$0xff]  ;;  %v387_v29 = vld [vmem:[#allocation7 + $0x258] sm:$0xff] }
  0x35   :  { %204 = vmatpush.msra.mxu0 %v98_v58  ;;  %1242 = vmatmul.msk.f32.vlgmr.msra.gmra.mxu1 %vm186_vm0, %v184_v59  ;;  %v358_v26 = vld [vmem:[#allocation7 + $0x170] sm:$0xff]  ;;  %v333_v28 = vld [vmem:[#allocation7 + $0xa8] sm:$0xff]  ;;  %v355_v30 = vld [vmem:[#allocation7 + $0x158] sm:$0xff] }
  0x36   :  { %276 = vmatpush.msrb.mxu1 %v124_v57  ;;  %244 = vmatpush.msra.mxu2 %v99_v60  ;;  %v450_v27 = vld [vmem:[#allocation7 + $0x450] sm:$0xff]  ;;  %v447_v31 = vld [vmem:[#allocation7 + $0x438] sm:$0xff]  ;;  %v384_v33 = vld [vmem:[#allocation7 + $0x240] sm:$0xff] }
  0x37   :  { %205 = vmatmul.f32.vlgmr.msra.gmra.mxu0 %v1466_v61  ;;  %245 = vmatmul.f32.vlgmr.msra.gmra.mxu2 %v1466_v61  ;;  %v330_v32 = vld [vmem:[#allocation7 + $0x90] sm:$0xff]  ;;  %v352_v34 = vld [vmem:[#allocation7 + $0x140] sm:$0xff]  ;;  %v327_v36 = vld [vmem:[#allocation7 + $0x78] sm:$0xff] }
  0x38   :  { %277 = vmatpush.msrb.mxu1 %v121_v62  ;;  %465 = vmatpush.msrb.mxu0 %v357_v63  ;;  %v444_v35 = vld [vmem:[#allocation7 + $0x420] sm:$0xff]  ;;  %v381_v37 = vld [vmem:[#allocation7 + $0x228] sm:$0xff]  ;;  %v378_v41 = vld [vmem:[#allocation7 + $0x210] sm:$0xff] }
  0x39   :  { %485 = vmatpush.msrb.mxu2 %v405_v3  ;;  %301 = vmatpush.msrb.mxu3 %v157_v5  ;;  %v349_v38 = vld [vmem:[#allocation7 + $0x128] sm:$0xff]  ;;  %v324_v40 = vld [vmem:[#allocation7 + $0x60] sm:$0xff]  ;;  %v346_v42 = vld [vmem:[#allocation7 + $0x110] sm:$0xff] }
  0x3a   :  { %278 = vmatpush.msrb.mxu1 %v118_v0  ;;  %466 = vmatpush.msrb.mxu0 %v354_v2  ;;  %v441_v39 = vld [vmem:[#allocation7 + $0x408] sm:$0xff]  ;;  %v438_v43 = vld [vmem:[#allocation7 + $0x3f0] sm:$0xff]  ;;  %v375_v45 = vld [vmem:[#allocation7 + $0x1f8] sm:$0xff] }
  0x3b   :  { %486 = vmatpush.msrb.mxu2 %v402_v7  ;;  %302 = vmatpush.msrb.mxu3 %v154_v9  ;;  %v321_v44 = vld [vmem:[#allocation7 + $0x48] sm:$0xff]  ;;  %v343_v46 = vld [vmem:[#allocation7 + $0xf8] sm:$0xff]  ;;  %v318_v48 = vld [vmem:[#allocation7 + $0x30] sm:$0xff] }
  0x3c   :  { %279 = vmatpush.msrb.mxu1 %v115_v4  ;;  %467 = vmatpush.msrb.mxu0 %v351_v6  ;;  %v435_v47 = vld [vmem:[#allocation7 + $0x3d8] sm:$0xff]  ;;  %v372_v49 = vld [vmem:[#allocation7 + $0x1e0] sm:$0xff]  ;;  %v369_v53 = vld [vmem:[#allocation7 + $0x1c8] sm:$0xff] }
  0x3d   :  { %487 = vmatpush.msrb.mxu2 %v399_v11  ;;  %303 = vmatpush.msrb.mxu3 %v151_v13  ;;  %v340_v50 = vld [vmem:[#allocation7 + $0xe0] sm:$0xff]  ;;  %v315_v52 = vld [vmem:[#allocation7 + $0x18] sm:$0xff]  ;;  %v337_v54 = vld [vmem:[#allocation7 + $0xc8] sm:$0xff] }
  0x3e   :  { %280 = vmatpush.msrb.mxu1 %v112_v8  ;;  %468 = vmatpush.msrb.mxu0 %v348_v10  ;;  %v432_v51 = vld [vmem:[#allocation7 + $0x3c0] sm:$0xff]  ;;  %v429_v55 = vld [vmem:[#allocation7 + $0x3a8] sm:$0xff]  ;;  %v366_v57 = vld [vmem:[#allocation7 + $0x1b0] sm:$0xff] }
  0x3f   :  { %488 = vmatpush.msrb.mxu2 %v396_v15  ;;  %304 = vmatpush.msrb.mxu3 %v148_v17  ;;  %v312_v56 = vld [vmem:[#allocation7] sm:$0xff]  ;;  %v334_v58 = vld [vmem:[#allocation7 + $0xb0] sm:$0xff]  ;;  %v331_v62 = vld [vmem:[#allocation7 + $0x98] sm:$0xff] }
  0x40   :  { %281 = vmatpush.msrb.mxu1 %v109_v12  ;;  %469 = vmatpush.msrb.mxu0 %v345_v14  ;;  %v426_v60 = vld [vmem:[#allocation7 + $0x390] sm:$0xff]  ;;  %v403_v63 = vld [vmem:[#allocation7 + $0x2d8] sm:$0xff]  ;;  %v360_v1 = vld [vmem:[#allocation7 + $0x180] sm:$0xff] }
  0x41   :  { %1244 = vmatmul.msk.f32.vlgmr.msrb.gmra.mxu3 %vm186_vm0, %v184_v59  ;;  %489 = vmatpush.msrb.mxu2 %v393_v20  ;;  %v406_v59 = vld [vmem:[#allocation7 + $0x2f0] sm:$0xff]  ;;  %v423_v0 = vld [vmem:[#allocation7 + $0x378] sm:$0xff]  ;;  %v328_v2 = vld [vmem:[#allocation7 + $0x80] sm:$0xff] }
  0x42   :  { %282 = vmatpush.msrb.mxu1 %v106_v16  ;;  %470 = vmatpush.msrb.mxu0 %v342_v18  ;;  %v400_v3 = vld [vmem:[#allocation7 + $0x2c0] sm:$0xff]  ;;  %v454_v5 = vld [vmem:[#allocation7 + $0x470] sm:$0xff]  ;;  %v325_v6 = vld [vmem:[#allocation7 + $0x68] sm:$0xff] }
  0x43   :  { %505 = vmatpush.msra.mxu3 %v453_v22  ;;  %490 = vmatpush.msrb.mxu2 %v390_v24  ;;  %v420_v4 = vld [vmem:[#allocation7 + $0x360] sm:$0xff]  ;;  %v397_v7 = vld [vmem:[#allocation7 + $0x2a8] sm:$0xff]  ;;  %v451_v9 = vld [vmem:[#allocation7 + $0x458] sm:$0xff] }
  0x44   :  { %283 = vmatpush.msrb.mxu1 %v103_v19  ;;  %471 = vmatpush.msrb.mxu0 %v339_v21  ;;  %v417_v8 = vld [vmem:[#allocation7 + $0x348] sm:$0xff]  ;;  %v322_v10 = vld [vmem:[#allocation7 + $0x50] sm:$0xff]  ;;  %v448_v13 = vld [vmem:[#allocation7 + $0x440] sm:$0xff] }
  0x45   :  { %506 = vmatpush.msra.mxu3 %v450_v27  ;;  %491 = vmatpush.msrb.mxu2 %v387_v29  ;;  %v394_v11 = vld [vmem:[#allocation7 + $0x290] sm:$0xff]  ;;  %v319_v14 = vld [vmem:[#allocation7 + $0x38] sm:$0xff]  ;;  %v445_v17 = vld [vmem:[#allocation7 + $0x428] sm:$0xff] }
  0x46   :  { %284 = vmatpush.msrb.mxu1 %v100_v23  ;;  %472 = vmatpush.msrb.mxu0 %v336_v25  ;;  %v414_v12 = vld [vmem:[#allocation7 + $0x330] sm:$0xff]  ;;  %v391_v15 = vld [vmem:[#allocation7 + $0x278] sm:$0xff]  ;;  %v316_v18 = vld [vmem:[#allocation7 + $0x20] sm:$0xff] }
  0x47   :  { %285 = vmatmul.f32.vlgmr.msrb.gmra.mxu1 %v1466_v61  ;;  %507 = vmatpush.msra.mxu3 %v447_v31  ;;  %v363_v61 = vld [vmem:[#allocation7 + $0x198] sm:$0xff]  ;;  %v388_v19 = vld [vmem:[#allocation7 + $0x260] sm:$0xff]  ;;  %v442_v21 = vld [vmem:[#allocation7 + $0x410] sm:$0xff] }
  0x48   :  { %525 = vmatpush.msra.mxu1 %v358_v26  ;;  %473 = vmatpush.msrb.mxu0 %v333_v28  ;;  %v411_v16 = vld [vmem:[#allocation7 + $0x318] sm:$0xff]  ;;  %v408_v20 = vld [vmem:[#allocation7 + $0x300] sm:$0xff]  ;;  %v313_v22 = vld [vmem:[#allocation7 + $0x8] sm:$0xff] }
  0x49   :  { %492 = vmatpush.msrb.mxu2 %v384_v33  ;;  %508 = vmatpush.msra.mxu3 %v444_v35  ;;  %v385_v23 = vld [vmem:[#allocation7 + $0x248] sm:$0xff]  ;;  %v407_v24 = vld [vmem:[#allocation7 + $0x2f8] sm:$0xff]  ;;  %v382_v26 = vld [vmem:[#allocation7 + $0x230] sm:$0xff] }
  0x4a   :  { %526 = vmatpush.msra.mxu1 %v355_v30  ;;  %474 = vmatpush.msrb.mxu0 %v330_v32  ;;  %v359_v25 = vld [vmem:[#allocation7 + $0x178] sm:$0xff]  ;;  %v404_v27 = vld [vmem:[#allocation7 + $0x2e0] sm:$0xff]  ;;  %v401_v29 = vld [vmem:[#allocation7 + $0x2c8] sm:$0xff] }
  0x4b   :  { %493 = vmatpush.msrb.mxu2 %v381_v37  ;;  %509 = vmatpush.msra.mxu3 %v441_v39  ;;  %v379_v28 = vld [vmem:[#allocation7 + $0x218] sm:$0xff]  ;;  %v376_v30 = vld [vmem:[#allocation7 + $0x200] sm:$0xff]  ;;  %v398_v31 = vld [vmem:[#allocation7 + $0x2b0] sm:$0xff] }
  0x4c   :  { %527 = vmatpush.msra.mxu1 %v352_v34  ;;  %475 = vmatpush.msrb.mxu0 %v327_v36  ;;  %v373_v32 = vld [vmem:[#allocation7 + $0x1e8] sm:$0xff]  ;;  %v395_v33 = vld [vmem:[#allocation7 + $0x298] sm:$0xff]  ;;  %v392_v34 = vld [vmem:[#allocation7 + $0x280] sm:$0xff] }
  0x4d   :  { %494 = vmatpush.msrb.mxu2 %v378_v41  ;;  %510 = vmatpush.msra.mxu3 %v438_v43  ;;  %v389_v35 = vld [vmem:[#allocation7 + $0x268] sm:$0xff]  ;;  %v386_v36 = vld [vmem:[#allocation7 + $0x250] sm:$0xff]  ;;  %v439_v39 = vld [vmem:[#allocation7 + $0x3f8] sm:$0xff] }
  0x4e   :  { %528 = vmatpush.msra.mxu1 %v349_v38  ;;  %476 = vmatpush.msrb.mxu0 %v324_v40  ;;  %v370_v37 = vld [vmem:[#allocation7 + $0x1d0] sm:$0xff]  ;;  %v383_v38 = vld [vmem:[#allocation7 + $0x238] sm:$0xff]  ;;  %v356_v40 = vld [vmem:[#allocation7 + $0x160] sm:$0xff] }
  0x4f   :  { %495 = vmatpush.msrb.mxu2 %v375_v45  ;;  %511 = vmatpush.msra.mxu3 %v435_v47  ;;  %v367_v41 = vld [vmem:[#allocation7 + $0x1b8] sm:$0xff]  ;;  %v436_v43 = vld [vmem:[#allocation7 + $0x3e0] sm:$0xff]  ;;  %v433_v47 = vld [vmem:[#allocation7 + $0x3c8] sm:$0xff] }
  0x50   :  { %529 = vmatpush.msra.mxu1 %v346_v42  ;;  %477 = vmatpush.msrb.mxu0 %v321_v44  ;;  %v380_v42 = vld [vmem:[#allocation7 + $0x220] sm:$0xff]  ;;  %v353_v44 = vld [vmem:[#allocation7 + $0x148] sm:$0xff] }
  0x51   :  { %496 = vmatpush.msrb.mxu2 %v372_v49  ;;  %512 = vmatpush.msra.mxu3 %v432_v51  ;;  %v364_v45 = vld [vmem:[#allocation7 + $0x1a0] sm:$0xff]  ;;  %v361_v49 = vld [vmem:[#allocation7 + $0x188] sm:$0xff]  ;;  %v430_v51 = vld [vmem:[#allocation7 + $0x3b0] sm:$0xff] }
  0x52   :  { %530 = vmatpush.msra.mxu1 %v343_v46  ;;  %478 = vmatpush.msrb.mxu0 %v318_v48  ;;  %v377_v46 = vld [vmem:[#allocation7 + $0x208] sm:$0xff]  ;;  %v350_v48 = vld [vmem:[#allocation7 + $0x130] sm:$0xff] }
  0x53   :  { %497 = vmatpush.msrb.mxu2 %v369_v53  ;;  %513 = vmatpush.msra.mxu3 %v429_v55  ;;  %v371_v53 = vld [vmem:[#allocation7 + $0x1d8] sm:$0xff]  ;;  %v344_v55 = vld [vmem:[#allocation7 + $0x100] sm:$0xff] }
  0x54   :  { %531 = vmatpush.msra.mxu1 %v340_v50  ;;  %479 = vmatpush.msrb.mxu0 %v315_v52  ;;  %v374_v50 = vld [vmem:[#allocation7 + $0x1f0] sm:$0xff]  ;;  %v347_v52 = vld [vmem:[#allocation7 + $0x118] sm:$0xff] }
  0x55   :  { %498 = vmatpush.msrb.mxu2 %v366_v57  ;;  %514 = vmatpush.msra.mxu3 %v426_v60  ;;  %v424_v57 = vld [vmem:[#allocation7 + $0x380] sm:$0xff]  ;;  %v421_v60 = vld [vmem:[#allocation7 + $0x368] sm:$0xff] }
  0x56   :  { %532 = vmatpush.msra.mxu1 %v337_v54  ;;  %480 = vmatpush.msrb.mxu0 %v312_v56  ;;  %v427_v54 = vld [vmem:[#allocation7 + $0x398] sm:$0xff]  ;;  %v368_v56 = vld [vmem:[#allocation7 + $0x1c0] sm:$0xff] }
  0x57   :  { %499 = vmatpush.msrb.mxu2 %v363_v61  ;;  %515 = vmatpush.msra.mxu3 %v423_v0  ;;  %v338_v61 = vld [vmem:[#allocation7 + $0xd0] sm:$0xff]  ;;  %v335_v0 = vld [vmem:[#allocation7 + $0xb8] sm:$0xff] }
  0x58   :  { %533 = vmatpush.msra.mxu1 %v334_v58  ;;  %545 = vmatpush.msra.mxu0 %v406_v59  ;;  %v341_v58 = vld [vmem:[#allocation7 + $0xe8] sm:$0xff] }
  0x59   :  { %500 = vmatpush.msrb.mxu2 %v360_v1  ;;  %516 = vmatpush.msra.mxu3 %v420_v4  ;;  %v365_v59 = vld [vmem:[#allocation7 + $0x1a8] sm:$0xff]  ;;  %v415_v1 = vld [vmem:[#allocation7 + $0x338] sm:$0xff] }
  0x5a   :  { %534 = vmatpush.msra.mxu1 %v331_v62  ;;  %546 = vmatpush.msra.mxu0 %v403_v63  ;;  %v362_v62 = vld [vmem:[#allocation7 + $0x190] sm:$0xff]  ;;  %v329_v4 = vld [vmem:[#allocation7 + $0x88] sm:$0xff] }
  0x5b   :  { %565 = vmatpush.msra.mxu2 %v454_v5  ;;  %517 = vmatpush.msra.mxu3 %v417_v8  ;;  %v418_v63 = vld [vmem:[#allocation7 + $0x350] sm:$0xff]  ;;  %v409_v5 = vld [vmem:[#allocation7 + $0x308] sm:$0xff]  ;;  %v323_v8 = vld [vmem:[#allocation7 + $0x58] sm:$0xff] }
  0x5c   :  { %535 = vmatpush.msra.mxu1 %v328_v2  ;;  %547 = vmatpush.msra.mxu0 %v400_v3  ;;  %v332_v2 = vld [vmem:[#allocation7 + $0xa0] sm:$0xff] }
  0x5d   :  { %566 = vmatpush.msra.mxu2 %v451_v9  ;;  %518 = vmatpush.msra.mxu3 %v414_v12  ;;  %v412_v3 = vld [vmem:[#allocation7 + $0x320] sm:$0xff]  ;;  %v314_v12 = vld [vmem:[#allocation7 + $0x10] sm:$0xff] }
  0x5e   :  { %536 = vmatpush.msra.mxu1 %v325_v6  ;;  %548 = vmatpush.msra.mxu0 %v397_v7  ;;  %v326_v6 = vld [vmem:[#allocation7 + $0x70] sm:$0xff]  ;;  %v1474_v7 = vld [vmem:[#allocation10] sm:$0xff] }
  0x5f   :  { %567 = vmatpush.msra.mxu2 %v448_v13  ;;  %519 = vmatpush.msra.mxu3 %v411_v16  ;;  %v320_v9 = vld [vmem:[#allocation7 + $0x40] sm:$0xff]  ;;  %v173_v16 = vperm.slane %v1474_v7, 4 }
  0x60   :  { %537 = vmatpush.msra.mxu1 %v322_v10  ;;  %549 = vmatpush.msra.mxu0 %v394_v11  ;;  %v172_v10 = vperm.slane %v1474_v7, 0  ;;  %v317_v11 = vld [vmem:[#allocation7 + $0x28] sm:$0xff] }
  0x61   :  { %568 = vmatpush.msra.mxu2 %v445_v17  ;;  %520 = vmatpush.msra.mxu3 %v408_v20 }
  0x62   :  { %538 = vmatpush.msra.mxu1 %v319_v14  ;;  %550 = vmatpush.msra.mxu0 %v391_v15  ;;  %v178_v13 = vperm.slane %v172_v10, 0  ;;  %v1559_v10 = vld [vmem:[#allocation8 + $0x270] sm:$0xff] }
  0x63   :  { %569 = vmatpush.msra.mxu2 %v442_v21  ;;  %585 = vmatpush.msrb.mxu3 %v359_v25  ;;  %v455_v21 = vld [vmem:[#allocation7 + $0x478] sm:$0xff] }
  0x64   :  { %539 = vmatpush.msra.mxu1 %v316_v18  ;;  %551 = vmatpush.msra.mxu0 %v388_v19  ;;  %v179_v19 = vperm.slane %v173_v16, 0  ;;  %v1573_v16 = vld [vmem:[#allocation8 + $0x48] sm:$0xff] }
  0x65   :  { %570 = vmatpush.msra.mxu2 %v439_v39  ;;  %586 = vmatpush.msrb.mxu3 %v356_v40  ;;  %v437_v39 = vld [vmem:[#allocation7 + $0x3e8] sm:$0xff]  ;;  %v1490_v40 = vld [vmem:[#allocation8 + $0x138] sm:$0xff] }
  0x66   :  { %540 = vmatpush.msra.mxu1 %v313_v22  ;;  %552 = vmatpush.msra.mxu0 %v385_v23  ;;  %v1480_v22 = vld [vmem:[#allocation10 + $0x8] sm:$0xf] }
  0x67   :  { %571 = vmatpush.msra.mxu2 %v436_v43  ;;  %587 = vmatpush.msrb.mxu3 %v353_v44  ;;  %v434_v44 = vld [vmem:[#allocation7 + $0x3d0] sm:$0xff] }
  0x68   :  { %605 = vmatpush.msrb.mxu1 %v407_v24  ;;  %553 = vmatpush.msra.mxu0 %v382_v26  ;;  %v452_v24 = vld [vmem:[#allocation7 + $0x460] sm:$0xff] }
  0x69   :  { %572 = vmatpush.msra.mxu2 %v433_v47  ;;  %588 = vmatpush.msrb.mxu3 %v350_v48  ;;  %v431_v48 = vld [vmem:[#allocation7 + $0x3b8] sm:$0xff] }
  0x6a   :  { %606 = vmatpush.msrb.mxu1 %v404_v27  ;;  %554 = vmatpush.msra.mxu0 %v379_v28  ;;  %v449_v27 = vld [vmem:[#allocation7 + $0x448] sm:$0xff]  ;;  %v174_v28 = vperm.slane %v1480_v22, 0 }
  0x6b   :  { %573 = vmatpush.msra.mxu2 %v430_v51  ;;  %589 = vmatpush.msrb.mxu3 %v347_v52  ;;  %v1509_v51 = vld [vmem:[#allocation8 + $0x438] sm:$0xff]  ;;  %v428_v52 = vld [vmem:[#allocation7 + $0x3a0] sm:$0xff] }
  0x6c   :  { %607 = vmatpush.msrb.mxu1 %v401_v29  ;;  %555 = vmatpush.msra.mxu0 %v376_v30  ;;  %v446_v30 = vld [vmem:[#allocation7 + $0x430] sm:$0xff] }
  0x6d   :  { %574 = vmatpush.msra.mxu2 %v427_v54  ;;  %590 = vmatpush.msrb.mxu3 %v344_v55  ;;  %v1516_v54 = vld [vmem:[#allocation8 + $0x2d0] sm:$0xff]  ;;  %v1518_v55 = vld [vmem:[#allocation8 + $0x420] sm:$0xff] }
  0x6e   :  { %608 = vmatpush.msrb.mxu1 %v398_v31  ;;  %556 = vmatpush.msra.mxu0 %v373_v32  ;;  %v180_v32 = vperm.slane %v174_v28, 0  ;;  %v1607_v28 = vld [vmem:[#allocation8 + $0x1f8] sm:$0xff] }
  0x6f   :  { %575 = vmatpush.msra.mxu2 %v424_v57  ;;  %591 = vmatpush.msrb.mxu3 %v341_v58  ;;  %v1520_v57 = vld [vmem:[#allocation8 + $0xd8] sm:$0xff]  ;;  %2197 = vst [vmem:[#allocation18_spill] sm:$0xff] %v1607_v28 }
  0x70   :  { %609 = vmatpush.msrb.mxu1 %v395_v33  ;;  %557 = vmatpush.msra.mxu0 %v370_v37  ;;  %v443_v33 = vld [vmem:[#allocation7 + $0x418] sm:$0xff] }
  0x71   :  { %576 = vmatpush.msra.mxu2 %v421_v60  ;;  %592 = vmatpush.msrb.mxu3 %v338_v61  ;;  %v1525_v58 = vld [vmem:[#allocation8 + $0x2b8] sm:$0xff]  ;;  %v422_v60 = vld [vmem:[#allocation7 + $0x370] sm:$0xff]  ;;  %v1529_v61 = vld [vmem:[#allocation8 + $0xc0] sm:$0xff] }
  0x72   :  { %610 = vmatpush.msrb.mxu1 %v392_v34  ;;  %558 = vmatpush.msra.mxu0 %v367_v41  ;;  %v1485_v34 = vld [vmem:[#allocation8 + $0x168] sm:$0xff] }
  0x73   :  { %577 = vmatpush.msra.mxu2 %v418_v63  ;;  %593 = vmatpush.msrb.mxu3 %v335_v0  ;;  %v419_v63 = vld [vmem:[#allocation7 + $0x358] sm:$0xff]  ;;  %v1536_v0 = vld [vmem:[#allocation8 + $0xa8] sm:$0xff] }
  0x74   :  { %611 = vmatpush.msrb.mxu1 %v389_v35  ;;  %559 = vmatpush.msra.mxu0 %v364_v45  ;;  %v440_v35 = vld [vmem:[#allocation7 + $0x400] sm:$0xff] }
  0x75   :  { %578 = vmatpush.msra.mxu2 %v415_v1  ;;  %594 = vmatpush.msrb.mxu3 %v332_v2  ;;  %v1495_v45 = vld [vmem:[#allocation8 + $0x120] sm:$0xff]  ;;  %v1543_v2 = vld [vmem:[#allocation8 + $0x3d8] sm:$0xff] }
  0x76   :  { %612 = vmatpush.msrb.mxu1 %v386_v36  ;;  %560 = vmatpush.msra.mxu0 %v361_v49  ;;  %v1487_v36 = vld [vmem:[#allocation8 + $0x150] sm:$0xff]  ;;  %v1503_v49 = vld [vmem:[#allocation8 + $0x108] sm:$0xff]  ;;  %v1541_v1 = vld [vmem:[#allocation8 + $0x2a0] sm:$0xff] }
  0x77   :  { %579 = vmatpush.msra.mxu2 %v412_v3  ;;  %595 = vmatpush.msrb.mxu3 %v329_v4  ;;  %v416_v3 = vld [vmem:[#allocation7 + $0x340] sm:$0xff]  ;;  %v1546_v4 = vld [vmem:[#allocation8 + $0x90] sm:$0xff] }
  0x78   :  { %613 = vmatpush.msrb.mxu1 %v383_v38 }
  0x79   :  { %580 = vmatpush.msra.mxu2 %v409_v5  ;;  %596 = vmatpush.msrb.mxu3 %v326_v6  ;;  %v1550_v5 = vld [vmem:[#allocation8 + $0x288] sm:$0xff]  ;;  %v1552_v6 = vld [vmem:[#allocation8 + $0x3c0] sm:$0xff] }
  0x7a   :  { %614 = vmatpush.msrb.mxu1 %v380_v42  ;;  %v1493_v42 = vld [vmem:[#allocation8 + $0x468] sm:$0xff] }
  0x7b   :  { %597 = vmatpush.msrb.mxu3 %v323_v8  ;;  %v413_v8 = vld [vmem:[#allocation7 + $0x328] sm:$0xff] }
  0x7c   :  { %615 = vmatpush.msrb.mxu1 %v377_v46  ;;  %v1499_v46 = vld [vmem:[#allocation8 + $0x450] sm:$0xff] }
  0x7d   :  { %598 = vmatpush.msrb.mxu3 %v320_v9  ;;  %v1555_v9 = vld [vmem:[#allocation8 + $0x78] sm:$0xff] }
  0x7e   :  { %616 = vmatpush.msrb.mxu1 %v374_v50  ;;  %v1507_v50 = vld [vmem:[#allocation8 + $0x2e8] sm:$0xff] }
  0x7f   :  { %599 = vmatpush.msrb.mxu3 %v317_v11  ;;  %v1561_v11 = vld [vmem:[#allocation8 + $0x3a8] sm:$0xff] }
  0x80   :  { %617 = vmatpush.msrb.mxu1 %v371_v53  ;;  %v1513_v53 = vld [vmem:[#allocation8 + $0xf0] sm:$0xff] }
  0x81   :  { %600 = vmatpush.msrb.mxu3 %v314_v12  ;;  %v410_v12 = vld [vmem:[#allocation7 + $0x310] sm:$0xff] }
  0x82   :  { %618 = vmatpush.msrb.mxu1 %v368_v56  ;;  %v425_v56 = vld [vmem:[#allocation7 + $0x388] sm:$0xff] }
  0x84   :  { %619 = vmatpush.msrb.mxu1 %v365_v59  ;;  %v1527_v59 = vld [vmem:[#allocation8 + $0x408] sm:$0xff] }
  0x86   :  { %620 = vmatpush.msrb.mxu1 %v362_v62  ;;  %v1534_v62 = vld [vmem:[#allocation8 + $0x3f0] sm:$0xff] }
  0xb2   :  { %v226_v15 = vpop.f32.mrf.mxu1 }
  0xb4   :  { %v206_v14 = vpop.f32.mrf.mxu0 }
  0xb5   :  { %v207_v17 = vadd.f32 %v206_v14, %v178_v13  ;;  %v266_v26 = vpop.f32.mrf.mxu3  ;;  %v1564_v13 = vld [vmem:[#allocation8 + $0x60] sm:$0xff]  ;;  %v1568_v14 = vld [vmem:[#allocation8 + $0x258] sm:$0xff] }
  0xb7   :  { %v227_v18 = vadd.f32 %v226_v15, %v207_v17  ;;  %v1570_v15 = vld [vmem:[#allocation8 + $0x170] sm:$0xff]  ;;  %v1577_v17 = vld [vmem:[#allocation8 + $0x240] sm:$0xff] }
  0xb9   :  { %v1478_v20 = vmax.f32 %v227_v18, 0.0  ;;  %v1580_v18 = vld [vmem:[#allocation8 + $0x158] sm:$0xff] }
  0xba   :  { %v246_v23 = vpop.f32.mrf.mxu2 }
  0xbb   :  { %481 = vmatmul.f32.vlgmr.msrb.gmra.mxu0 %v1478_v20  ;;  %541 = vmatmul.f32.vlgmr.msra.gmra.mxu1 %v1478_v20  ;;  %v247_v25 = vadd.f32 %v246_v23, %v179_v19  ;;  %v1583_v19 = vld [vmem:[#allocation8 + $0x30] sm:$0xff]  ;;  %v1592_v23 = vld [vmem:[#allocation8 + $0x18] sm:$0xff] }
  0xbc   :  { %625 = vmatpush.msrb.mxu0 %v455_v21  ;;  %829 = vmatpush.msra.mxu1 %v1493_v42  ;;  %v1589_v21 = vld [vmem:[#allocation8 + $0x140] sm:$0xff] }
  0xbd   :  { %v267_v29 = vadd.f32 %v266_v26, %v247_v25  ;;  %2195 = vst [vmem:[#allocation16_spill] sm:$0xff] %v1589_v21  ;;  %v1598_v25 = vld [vmem:[#allocation8 + $0x128] sm:$0xff]  ;;  %v1601_v26 = vld [vmem:[#allocation8] sm:$0xff] }
  0xbe   :  { %626 = vmatpush.msrb.mxu0 %v452_v24  ;;  %830 = vmatpush.msra.mxu1 %v1499_v46  ;;  %v1596_v24 = vld [vmem:[#allocation8 + $0x210] sm:$0xff]  ;;  %2196 = vst [vmem:[#allocation17_spill] sm:$0xff] %v1598_v25 }
  0xbf   :  { %v310_v31 = vmax.f32 %v267_v29, 0.0  ;;  %v1609_v29 = vld [vmem:[#allocation8 + $0x110] sm:$0xff] }
  0xc0   :  { %627 = vmatpush.msrb.mxu0 %v449_v27  ;;  %831 = vmatpush.msra.mxu1 %v1509_v51  ;;  %v1605_v27 = vld [vmem:[#allocation8 + $0x2f0] sm:$0xff]  ;;  %2198 = vst [vmem:[#allocation19_spill] sm:$0xff] %v1609_v29 }
  0xc1   :  { %501 = vmatmul.f32.vlgmr.msrb.gmra.mxu2 %v310_v31 }
  0xc2   :  { %628 = vmatpush.msrb.mxu0 %v446_v30  ;;  %789 = vmatpush.msrb.mxu2 %v1485_v34  ;;  %v1614_v30 = vld [vmem:[#allocation8 + $0x2d8] sm:$0xff] }
  0xc3   :  { %561 = vmatmul.f32.vlgmr.msra.gmra.mxu0 %v310_v31  ;;  %621 = vmatmul.f32.vlgmr.msrb.gmra.mxu1 %v310_v31  ;;  %v1616_v31 = vld [vmem:[#allocation8 + $0x1e0] sm:$0xff] }
  0xc4   :  { %v286_v37 = vpop.f32.mrf.mxu1  ;;  %629 = vmatpush.msrb.mxu0 %v443_v33  ;;  %v306_v41 = vpop.f32.mrf.mxu3  ;;  %790 = vmatpush.msrb.mxu2 %v1487_v36  ;;  %2199 = vst [vmem:[#allocation20_spill] sm:$0xff] %v1616_v31  ;;  %v1623_v33 = vld [vmem:[#allocation8 + $0x2c0] sm:$0xff] }
  0xc5   :  { %v287_v38 = vadd.f32 %v286_v37, %v180_v32  ;;  %832 = vmatpush.msra.mxu1 %v1518_v55  ;;  %v1618_v32 = vld [vmem:[#allocation8 + $0xf8] sm:$0xff]  ;;  %2201 = vst [vmem:[#allocation22_spill] sm:$0xff] %v1623_v33  ;;  %v1627_v37 = vld [vmem:[#allocation8 + $0xe0] sm:$0xff] }
  0xc6   :  { %630 = vmatpush.msrb.mxu0 %v440_v35  ;;  %791 = vmatpush.msrb.mxu2 %v1490_v40  ;;  %2200 = vst [vmem:[#allocation21_spill] sm:$0xff] %v1618_v32  ;;  %v1625_v35 = vld [vmem:[#allocation8 + $0x1c8] sm:$0xff] }
  0xc7   :  { %v307_v43 = vadd.f32 %v306_v41, %v287_v38  ;;  %833 = vmatpush.msra.mxu1 %v1527_v59  ;;  %2202 = vst [vmem:[#allocation23_spill] sm:$0xff] %v1625_v35  ;;  %v1632_v38 = vld [vmem:[#allocation8 + $0x2a8] sm:$0xff]  ;;  %v1639_v41 = vld [vmem:[#allocation8 + $0xb0] sm:$0xff] }
  0xc8   :  { %631 = vmatpush.msrb.mxu0 %v437_v39  ;;  %792 = vmatpush.msrb.mxu2 %v1495_v45  ;;  %2203 = vst [vmem:[#allocation24_spill] sm:$0xff] %v1627_v37  ;;  %v1634_v39 = vld [vmem:[#allocation8 + $0xc8] sm:$0xff] }
  0xc9   :  { %v1501_v47 = vmax.f32 %v307_v43, 0.0  ;;  %834 = vmatpush.msra.mxu1 %v1534_v62  ;;  %2204 = vst [vmem:[#allocation25_spill] sm:$0xff] %v1632_v38  ;;  %v1643_v43 = vld [vmem:[#allocation8 + $0x98] sm:$0xff] }
  0xca   :  { %632 = vmatpush.msrb.mxu0 %v434_v44  ;;  %793 = vmatpush.msrb.mxu2 %v1503_v49  ;;  %2205 = vst [vmem:[#allocation26_spill] sm:$0xff] %v1634_v39  ;;  %v1646_v44 = vld [vmem:[#allocation8 + $0x80] sm:$0xff] }
  0xcb   :  { %521 = vmatmul.f32.vlgmr.msra.gmra.mxu3 %v1501_v47  ;;  %581 = vmatmul.f32.vlgmr.msra.gmra.mxu2 %v1501_v47  ;;  %2206 = vst [vmem:[#allocation27_spill] sm:$0xff] %v1639_v41 }
  0xcc   :  { %633 = vmatpush.msrb.mxu0 %v431_v48  ;;  %809 = vmatpush.msra.mxu3 %v1507_v50  ;;  %2207 = vst [vmem:[#allocation28_spill] sm:$0xff] %v1643_v43  ;;  %v1652_v48 = vld [vmem:[#allocation8 + $0x50] sm:$0xff] }
  0xcd   :  { %794 = vmatpush.msrb.mxu2 %v1513_v53  ;;  %835 = vmatpush.msra.mxu1 %v1543_v2  ;;  %2208 = vst [vmem:[#allocation29_spill] sm:$0xff] %v1646_v44 }
  0xce   :  { %634 = vmatpush.msrb.mxu0 %v428_v52  ;;  %810 = vmatpush.msra.mxu3 %v1516_v54  ;;  %2210 = vst [vmem:[#allocation31_spill] sm:$0xff] %v1652_v48  ;;  %v1655_v52 = vld [vmem:[#allocation8 + $0x38] sm:$0xff] }
  0xcf   :  { %795 = vmatpush.msrb.mxu2 %v1520_v57  ;;  %836 = vmatpush.msra.mxu1 %v1552_v6  ;;  %2211 = vst [vmem:[#allocation32_spill] sm:$0xff] %v1655_v52 }
  0xd0   :  { %635 = vmatpush.msrb.mxu0 %v425_v56  ;;  %811 = vmatpush.msra.mxu3 %v1525_v58  ;;  %v1658_v56 = vld [vmem:[#allocation8 + $0x20] sm:$0xff] }
  0xd1   :  { %796 = vmatpush.msrb.mxu2 %v1529_v61  ;;  %837 = vmatpush.msra.mxu1 %v1561_v11  ;;  %2212 = vst [vmem:[#allocation33_spill] sm:$0xff] %v1658_v56 }
  0xd2   :  { %636 = vmatpush.msrb.mxu0 %v422_v60  ;;  %812 = vmatpush.msra.mxu3 %v1541_v1  ;;  %v1662_v60 = vld [vmem:[#allocation8 + $0x1b0] sm:$0xff] }
  0xd3   :  { %601 = vmatmul.f32.vlgmr.msrb.gmra.mxu3 %v1478_v20  ;;  %797 = vmatpush.msrb.mxu2 %v1536_v0  ;;  %v1587_v20 = vld [vmem:[#allocation8 + $0x228] sm:$0xff]  ;;  %2213 = vst [vmem:[#allocation34_spill] sm:$0xff] %v1662_v60 }
  0xd4   :  { %637 = vmatpush.msrb.mxu0 %v419_v63  ;;  %813 = vmatpush.msra.mxu3 %v1550_v5  ;;  %v1664_v63 = vld [vmem:[#allocation8 + $0x390] sm:$0xff] }
  0xd5   :  { %798 = vmatpush.msrb.mxu2 %v1546_v4  ;;  %838 = vmatpush.msra.mxu1 %v1664_v63 }
  0xd6   :  { %638 = vmatpush.msrb.mxu0 %v416_v3  ;;  %814 = vmatpush.msra.mxu3 %v1559_v10  ;;  %v1666_v3 = vld [vmem:[#allocation8 + $0x8] sm:$0xff] }
  0xd7   :  { %799 = vmatpush.msrb.mxu2 %v1555_v9  ;;  %2214 = vst [vmem:[#allocation35_spill] sm:$0xff] %v1666_v3 }
  0xd8   :  { %639 = vmatpush.msrb.mxu0 %v413_v8  ;;  %815 = vmatpush.msra.mxu3 %v1568_v14  ;;  %v1670_v8 = vld [vmem:[#allocation8 + $0x290] sm:$0xff] }
  0xd9   :  { %800 = vmatpush.msrb.mxu2 %v1564_v13  ;;  %2215 = vst [vmem:[#allocation36_spill] sm:$0xff] %v1670_v8 }
  0xda   :  { %640 = vmatpush.msrb.mxu0 %v410_v12  ;;  %816 = vmatpush.msra.mxu3 %v1577_v17  ;;  %v1672_v12 = vld [vmem:[#allocation8 + $0x2f8] sm:$0xff] }
  0xdb   :  { %641 = vmatmul.f32.vlgmr.msrb.gmra.mxu0 %v1501_v47  ;;  %801 = vmatpush.msrb.mxu2 %v1573_v16  ;;  %v1649_v47 = vld [vmem:[#allocation8 + $0x68] sm:$0xff]  ;;  %2216 = vst [vmem:[#allocation37_spill] sm:$0xff] %v1672_v12 }
  0xdc   :  { %849 = vmatpush.msra.mxu0 %v1570_v15  ;;  %817 = vmatpush.msra.mxu3 %v1587_v20  ;;  %2209 = vst [vmem:[#allocation30_spill] sm:$0xff] %v1649_v47 }
  0xdd   :  { %802 = vmatpush.msrb.mxu2 %v1583_v19 }
  0xde   :  { %850 = vmatpush.msra.mxu0 %v1580_v18  ;;  %818 = vmatpush.msra.mxu3 %v1596_v24 }
  0xdf   :  { %803 = vmatpush.msrb.mxu2 %v1592_v23 }
  0xe0   :  { %851 = vmatpush.msra.mxu0 %v1589_v21  ;;  %819 = vmatpush.msra.mxu3 %v1607_v28  ;;  %v458_v28 = vperm.slane %v1480_v22, 1  ;;  %v1895_v22 = vld [vmem:[#allocation8 + $0x430] sm:$0xff] }
  0xe1   :  { %804 = vmatpush.msrb.mxu2 %v1601_v26 }
  0xe2   :  { %852 = vmatpush.msra.mxu0 %v1598_v25  ;;  %820 = vmatpush.msra.mxu3 %v1616_v31 }
  0xe3   :  { %869 = vmatpush.msra.mxu2 %v1605_v27 }
  0xe4   :  { %853 = vmatpush.msra.mxu0 %v1609_v29  ;;  %821 = vmatpush.msra.mxu3 %v1625_v35  ;;  %v1762_v29 = vld [vmem:[#allocation8 + $0x1d0] sm:$0xff]  ;;  %v1768_v35 = vld [vmem:[#allocation8 + $0x148] sm:$0xff] }
  0xe5   :  { %870 = vmatpush.msra.mxu2 %v1614_v30  ;;  %2243 = vst [vmem:[#allocation64_spill] sm:$0xff] %v1762_v29 }
  0xe6   :  { %854 = vmatpush.msra.mxu0 %v1618_v32  ;;  %822 = vmatpush.msra.mxu3 %v1662_v60  ;;  %v1708_v32 = vld [vmem:[#allocation8 + $0x2b0] sm:$0xff]  ;;  %2245 = vst [vmem:[#allocation66_spill] sm:$0xff] %v1768_v35 }
  0xe7   :  { %871 = vmatpush.msra.mxu2 %v1623_v33  ;;  %2226 = vst [vmem:[#allocation47_spill] sm:$0xff] %v1708_v32  ;;  %v1744_v60 = vld [vmem:[#allocation8 + $0x410] sm:$0xff] }
  0xe8   :  { %855 = vmatpush.msra.mxu0 %v1627_v37  ;;  %v1702_v37 = vld [vmem:[#allocation8 + $0x248] sm:$0xff]  ;;  %2236 = vst [vmem:[#allocation57_spill] sm:$0xff] %v1744_v60 }
  0xe9   :  { %872 = vmatpush.msra.mxu2 %v1632_v38  ;;  %2224 = vst [vmem:[#allocation45_spill] sm:$0xff] %v1702_v37  ;;  %v1778_v38 = vld [vmem:[#allocation8 + $0x3c8] sm:$0xff] }
  0xea   :  { %856 = vmatpush.msra.mxu0 %v1634_v39  ;;  %v1696_v39 = vld [vmem:[#allocation8 + $0x2c8] sm:$0xff]  ;;  %2248 = vst [vmem:[#allocation69_spill] sm:$0xff] %v1778_v38 }
  0xeb   :  { %873 = vmatpush.msra.mxu2 %v1670_v8  ;;  %2223 = vst [vmem:[#allocation44_spill] sm:$0xff] %v1696_v39  ;;  %v1746_v8 = vld [vmem:[#allocation8 + $0x178] sm:$0xff] }
  0xec   :  { %857 = vmatpush.msra.mxu0 %v1639_v41  ;;  %v1690_v41 = vld [vmem:[#allocation8 + $0x260] sm:$0xff]  ;;  %2237 = vst [vmem:[#allocation58_spill] sm:$0xff] %v1746_v8 }
  0xed   :  { %2221 = vst [vmem:[#allocation42_spill] sm:$0xff] %v1690_v41 }
  0xee   :  { %858 = vmatpush.msra.mxu0 %v1643_v43  ;;  %v1688_v43 = vld [vmem:[#allocation8 + $0x360] sm:$0xff] }
  0xf0   :  { %859 = vmatpush.msra.mxu0 %v1646_v44  ;;  %v1686_v44 = vld [vmem:[#allocation8 + $0x180] sm:$0xff] }
  0xf1   :  { %2220 = vst [vmem:[#allocation41_spill] sm:$0xff] %v1686_v44 }
  0xf2   :  { %860 = vmatpush.msra.mxu0 %v1649_v47  ;;  %v1682_v47 = vld [vmem:[#allocation8 + $0x2e0] sm:$0xff] }
  0xf3   :  { %2219 = vst [vmem:[#allocation40_spill] sm:$0xff] %v1682_v47 }
  0xf4   :  { %861 = vmatpush.msra.mxu0 %v1652_v48  ;;  %v1674_v48 = vld [vmem:[#allocation8 + $0x198] sm:$0xff] }
  0xf5   :  { %2217 = vst [vmem:[#allocation38_spill] sm:$0xff] %v1674_v48  ;;  %823 = vmatpush.msra.mxu3 %v1674_v48  ;;  %v1706_v48 = vld [vmem:[#allocation8 + $0x458] sm:$0xff] }
  0xf6   :  { %862 = vmatpush.msra.mxu0 %v1655_v52  ;;  %v1680_v52 = vld [vmem:[#allocation8 + $0x278] sm:$0xff]  ;;  %2225 = vst [vmem:[#allocation46_spill] sm:$0xff] %v1706_v48 }
  0xf7   :  { %2218 = vst [vmem:[#allocation39_spill] sm:$0xff] %v1680_v52  ;;  %874 = vmatpush.msra.mxu2 %v1680_v52  ;;  %824 = vmatpush.msra.mxu3 %v1686_v44  ;;  %v1718_v44 = vld [vmem:[#allocation8 + $0x230] sm:$0xff]  ;;  %v1722_v52 = vld [vmem:[#allocation8 + $0x298] sm:$0xff] }
  0xf8   :  { %863 = vmatpush.msra.mxu0 %v1658_v56  ;;  %v1678_v56 = vld [vmem:[#allocation8 + $0x378] sm:$0xff]  ;;  %2227 = vst [vmem:[#allocation48_spill] sm:$0xff] %v1718_v44 }
  0xf9   :  { %839 = vmatpush.msra.mxu1 %v1678_v56  ;;  %875 = vmatpush.msra.mxu2 %v1690_v41  ;;  %v1720_v41 = vld [vmem:[#allocation8 + $0x440] sm:$0xff]  ;;  %2229 = vst [vmem:[#allocation50_spill] sm:$0xff] %v1722_v52 }
  0xfa   :  { %864 = vmatpush.msra.mxu0 %v1666_v3  ;;  %v1694_v3 = vld [vmem:[#allocation8 + $0x470] sm:$0xff]  ;;  %2228 = vst [vmem:[#allocation49_spill] sm:$0xff] %v1720_v41 }
  0xfb   :  { %2222 = vst [vmem:[#allocation43_spill] sm:$0xff] %v1694_v3  ;;  %840 = vmatpush.msra.mxu1 %v1688_v43  ;;  %889 = vmatpush.msrb.mxu3 %v1694_v3  ;;  %v1728_v3 = vld [vmem:[#allocation8 + $0x218] sm:$0xff] }
  0xfc   :  { %929 = vmatpush.msrb.mxu0 %v1672_v12  ;;  %v1700_v12 = vld [vmem:[#allocation8 + $0x348] sm:$0xff]  ;;  %876 = vmatpush.msra.mxu2 %v1702_v37  ;;  %2231 = vst [vmem:[#allocation52_spill] sm:$0xff] %v1728_v3 }
  0xfd   :  { %841 = vmatpush.msra.mxu1 %v1700_v12  ;;  %890 = vmatpush.msrb.mxu3 %v1706_v48  ;;  %v1730_v37 = vld [vmem:[#allocation8 + $0x428] sm:$0xff]  ;;  %v1738_v48 = vld [vmem:[#allocation8 + $0x300] sm:$0xff] }
  0xfe   :  { %930 = vmatpush.msrb.mxu0 %v1682_v47  ;;  %v1714_v47 = vld [vmem:[#allocation8 + $0x330] sm:$0xff]  ;;  %877 = vmatpush.msra.mxu2 %v1718_v44  ;;  %2232 = vst [vmem:[#allocation53_spill] sm:$0xff] %v1730_v37  ;;  %v1742_v44 = vld [vmem:[#allocation8 + $0x200] sm:$0xff] }
  0xff   :  { %842 = vmatpush.msra.mxu1 %v1714_v47  ;;  %891 = vmatpush.msrb.mxu3 %v1720_v41  ;;  %2234 = vst [vmem:[#allocation55_spill] sm:$0xff] %v1738_v48  ;;  %v1752_v41 = vld [vmem:[#allocation8 + $0x1e8] sm:$0xff] }
 0x100   :  { %931 = vmatpush.msrb.mxu0 %v1696_v39  ;;  %v1726_v39 = vld [vmem:[#allocation8 + $0x318] sm:$0xff]  ;;  %878 = vmatpush.msra.mxu2 %v1728_v3  ;;  %2235 = vst [vmem:[#allocation56_spill] sm:$0xff] %v1742_v44 }
 0x101   :  { %2230 = vst [vmem:[#allocation51_spill] sm:$0xff] %v1726_v39  ;;  %843 = vmatpush.msra.mxu1 %v1726_v39  ;;  %892 = vmatpush.msrb.mxu3 %v1730_v37  ;;  %v1754_v3 = vld [vmem:[#allocation8 + $0x3f8] sm:$0xff]  ;;  %v1760_v37 = vld [vmem:[#allocation8 + $0x250] sm:$0xff] }
 0x102   :  { %932 = vmatpush.msrb.mxu0 %v1708_v32  ;;  %v1734_v32 = vld [vmem:[#allocation8 + $0x280] sm:$0xff]  ;;  %879 = vmatpush.msra.mxu2 %v1742_v44  ;;  %2239 = vst [vmem:[#allocation60_spill] sm:$0xff] %v1752_v41 }
 0x103   :  { %2233 = vst [vmem:[#allocation54_spill] sm:$0xff] %v1734_v32  ;;  %844 = vmatpush.msra.mxu1 %v1738_v48  ;;  %893 = vmatpush.msrb.mxu3 %v1744_v60  ;;  %v1766_v44 = vld [vmem:[#allocation8 + $0x3e0] sm:$0xff]  ;;  %v1772_v60 = vld [vmem:[#allocation8 + $0x238] sm:$0xff] }
 0x104   :  { %933 = vmatpush.msrb.mxu0 %v1722_v52  ;;  %v1750_v52 = vld [vmem:[#allocation8 + $0x268] sm:$0xff]  ;;  %2240 = vst [vmem:[#allocation61_spill] sm:$0xff] %v1754_v3  ;;  %880 = vmatpush.msra.mxu2 %v1752_v41  ;;  %v1784_v41 = vld [vmem:[#allocation8 + $0x220] sm:$0xff] }
 0x105   :  { %2238 = vst [vmem:[#allocation59_spill] sm:$0xff] %v1750_v52  ;;  %909 = vmatpush.msrb.mxu1 %v1746_v8  ;;  %894 = vmatpush.msrb.mxu3 %v1754_v3  ;;  %v1774_v8 = vld [vmem:[#allocation8 + $0x1b8] sm:$0xff] }
 0x106   :  { %934 = vmatpush.msrb.mxu0 %v1734_v32  ;;  %v1758_v32 = vld [vmem:[#allocation8 + $0x160] sm:$0xff]  ;;  %2242 = vst [vmem:[#allocation63_spill] sm:$0xff] %v1760_v37  ;;  %881 = vmatpush.msra.mxu2 %v1762_v29  ;;  %v1792_v29 = vld [vmem:[#allocation8 + $0x3b0] sm:$0xff]  ;;  %v1794_v3 = vld [vmem:[#allocation8 + $0x118] sm:$0xff] }
 0x107   :  { %2241 = vst [vmem:[#allocation62_spill] sm:$0xff] %v1758_v32  ;;  %910 = vmatpush.msrb.mxu1 %v1758_v32  ;;  %895 = vmatpush.msrb.mxu3 %v1766_v44 }
 0x108   :  { %935 = vmatpush.msrb.mxu0 %v1750_v52  ;;  %2244 = vst [vmem:[#allocation65_spill] sm:$0xff] %v1766_v44  ;;  %v1780_v52 = vld [vmem:[#allocation8 + $0x130] sm:$0xff]  ;;  %882 = vmatpush.msra.mxu2 %v1774_v8  ;;  %v1798_v44 = vld [vmem:[#allocation8 + $0x208] sm:$0xff] }
 0x109   :  { %2246 = vst [vmem:[#allocation67_spill] sm:$0xff] %v1772_v60  ;;  %911 = vmatpush.msrb.mxu1 %v1768_v35  ;;  %896 = vmatpush.msrb.mxu3 %v1778_v38  ;;  %v1804_v38 = vld [vmem:[#allocation8 + $0x398] sm:$0xff] }
 0x10a   :  { %2247 = vst [vmem:[#allocation68_spill] sm:$0xff] %v1774_v8  ;;  %936 = vmatpush.msrb.mxu0 %v1760_v37  ;;  %v1790_v37 = vld [vmem:[#allocation8 + $0x1a0] sm:$0xff] }
 0x10b   :  { %2249 = vst [vmem:[#allocation70_spill] sm:$0xff] %v1780_v52  ;;  %912 = vmatpush.msrb.mxu1 %v1780_v52  ;;  %883 = vmatpush.msra.mxu2 %v1790_v37  ;;  %v1806_v8 = vld [vmem:[#allocation8 + $0x100] sm:$0xff]  ;;  %v1810_v52 = vld [vmem:[#allocation8 + $0x1f0] sm:$0xff] }
 0x10c   :  { %2250 = vst [vmem:[#allocation71_spill] sm:$0xff] %v1784_v41  ;;  %937 = vmatpush.msrb.mxu0 %v1772_v60  ;;  %897 = vmatpush.msrb.mxu3 %v1792_v29  ;;  %v1802_v60 = vld [vmem:[#allocation8 + $0x188] sm:$0xff] }
 0x10d   :  { %2251 = vst [vmem:[#allocation72_spill] sm:$0xff] %v1790_v37  ;;  %913 = vmatpush.msrb.mxu1 %v1794_v3  ;;  %884 = vmatpush.msra.mxu2 %v1802_v60  ;;  %v1819_v37 = vld [vmem:[#allocation8 + $0x1d8] sm:$0xff] }
 0x10e   :  { %2252 = vst [vmem:[#allocation73_spill] sm:$0xff] %v1792_v29  ;;  %938 = vmatpush.msrb.mxu0 %v1784_v41  ;;  %898 = vmatpush.msrb.mxu3 %v1804_v38  ;;  %v1815_v41 = vld [vmem:[#allocation8 + $0x380] sm:$0xff]  ;;  %v1817_v29 = vld [vmem:[#allocation8 + $0xe8] sm:$0xff] }
 0x10f   :  { %2253 = vst [vmem:[#allocation74_spill] sm:$0xff] %v1794_v3  ;;  %914 = vmatpush.msrb.mxu1 %v1806_v8 }
 0x110   :  { %2254 = vst [vmem:[#allocation75_spill] sm:$0xff] %v1798_v44  ;;  %939 = vmatpush.msrb.mxu0 %v1798_v44  ;;  %899 = vmatpush.msrb.mxu3 %v1815_v41  ;;  %v1824_v44 = vld [vmem:[#allocation8 + $0x368] sm:$0xff] }
 0x111   :  { %2255 = vst [vmem:[#allocation76_spill] sm:$0xff] %v1802_v60  ;;  %915 = vmatpush.msrb.mxu1 %v1817_v29  ;;  %v1826_v60 = vld [vmem:[#allocation8 + $0xd0] sm:$0xff] }
 0x112   :  { %2256 = vst [vmem:[#allocation77_spill] sm:$0xff] %v1804_v38  ;;  %940 = vmatpush.msrb.mxu0 %v1810_v52  ;;  %v1828_v38 = vld [vmem:[#allocation8 + $0x1c0] sm:$0xff]  ;;  %900 = vmatpush.msrb.mxu3 %v1824_v44 }
 0x113   :  { %2257 = vst [vmem:[#allocation78_spill] sm:$0xff] %v1806_v8  ;;  %916 = vmatpush.msrb.mxu1 %v1826_v60  ;;  %v1835_v8 = vld [vmem:[#allocation8 + $0xb8] sm:$0xff] }
 0x114   :  { %2258 = vst [vmem:[#allocation79_spill] sm:$0xff] %v1810_v52  ;;  %941 = vmatpush.msrb.mxu0 %v1819_v37  ;;  %v1833_v52 = vld [vmem:[#allocation8 + $0x350] sm:$0xff] }
 0x115   :  { %2259 = vst [vmem:[#allocation80_spill] sm:$0xff] %v1815_v41  ;;  %v1837_v41 = vld [vmem:[#allocation8 + $0x1a8] sm:$0xff]  ;;  %901 = vmatpush.msrb.mxu3 %v1833_v52  ;;  %917 = vmatpush.msrb.mxu1 %v1835_v8 }
 0x116   :  { %2260 = vst [vmem:[#allocation81_spill] sm:$0xff] %v1817_v29  ;;  %942 = vmatpush.msrb.mxu0 %v1828_v38  ;;  %v1844_v29 = vld [vmem:[#allocation8 + $0xa0] sm:$0xff] }
 0x117   :  { %2261 = vst [vmem:[#allocation82_spill] sm:$0xff] %v1819_v37  ;;  %v1842_v37 = vld [vmem:[#allocation8 + $0x338] sm:$0xff]  ;;  %918 = vmatpush.msrb.mxu1 %v1844_v29 }
 0x118   :  { %2262 = vst [vmem:[#allocation83_spill] sm:$0xff] %v1824_v44  ;;  %943 = vmatpush.msrb.mxu0 %v1837_v41  ;;  %v1846_v44 = vld [vmem:[#allocation8 + $0x190] sm:$0xff]  ;;  %902 = vmatpush.msrb.mxu3 %v1842_v37 }
 0x119   :  { %2263 = vst [vmem:[#allocation84_spill] sm:$0xff] %v1826_v60  ;;  %v1853_v60 = vld [vmem:[#allocation8 + $0x88] sm:$0xff] }
 0x11a   :  { %2264 = vst [vmem:[#allocation85_spill] sm:$0xff] %v1828_v38  ;;  %944 = vmatpush.msrb.mxu0 %v1846_v44  ;;  %v1851_v38 = vld [vmem:[#allocation8 + $0x320] sm:$0xff]  ;;  %919 = vmatpush.msrb.mxu1 %v1853_v60 }
 0x11b   :  { %2265 = vst [vmem:[#allocation86_spill] sm:$0xff] %v1833_v52  ;;  %903 = vmatpush.msrb.mxu3 %v1851_v38  ;;  %v1859_v52 = vld [vmem:[#allocation8 + $0x70] sm:$0xff] }
 0x11c   :  { %2266 = vst [vmem:[#allocation87_spill] sm:$0xff] %v1835_v8  ;;  %920 = vmatpush.msrb.mxu1 %v1859_v52  ;;  %v457_v8 = vperm.slane %v1474_v7, 5 }
 0x11d   :  { %2267 = vst [vmem:[#allocation88_spill] sm:$0xff] %v1837_v41  ;;  %v1857_v41 = vld [vmem:[#allocation8 + $0x308] sm:$0xff] }
 0x11e   :  { %2268 = vst [vmem:[#allocation89_spill] sm:$0xff] %v1842_v37  ;;  %904 = vmatpush.msrb.mxu3 %v1857_v41  ;;  %v1863_v37 = vld [vmem:[#allocation8 + $0x58] sm:$0xff] }
 0x11f   :  { %2269 = vst [vmem:[#allocation90_spill] sm:$0xff] %v1844_v29  ;;  %921 = vmatpush.msrb.mxu1 %v1863_v37  ;;  %v1866_v29 = vld [vmem:[#allocation8 + $0x40] sm:$0xff] }
 0x120   :  { %2270 = vst [vmem:[#allocation91_spill] sm:$0xff] %v1846_v44 }
 0x121   :  { %2271 = vst [vmem:[#allocation92_spill] sm:$0xff] %v1851_v38  ;;  %922 = vmatpush.msrb.mxu1 %v1866_v29  ;;  %v1869_v38 = vld [vmem:[#allocation8 + $0x28] sm:$0xff] }
 0x122   :  { %2272 = vst [vmem:[#allocation93_spill] sm:$0xff] %v1853_v60  ;;  %v456_v60 = vperm.slane %v1474_v7, 1 }
 0x123   :  { %2273 = vst [vmem:[#allocation94_spill] sm:$0xff] %v1857_v41  ;;  %923 = vmatpush.msrb.mxu1 %v1869_v38  ;;  %v1874_v41 = vld [vmem:[#allocation8 + $0x10] sm:$0xff] }
 0x124   :  { %2274 = vst [vmem:[#allocation95_spill] sm:$0xff] %v1859_v52  ;;  %v462_v3 = vperm.slane %v456_v60, 1  ;;  %v1886_v60 = vld [vmem:[#allocation8 + $0x460] sm:$0xff] }
 0x125   :  { %2275 = vst [vmem:[#allocation96_spill] sm:$0xff] %v1863_v37  ;;  %924 = vmatpush.msrb.mxu1 %v1874_v41  ;;  %v463_v37 = vperm.slane %v457_v8, 1  ;;  %v2314_v8 = vld [vmem:[#allocation81_spill] sm:$0xff] }
 0x126   :  { %2276 = vst [vmem:[#allocation97_spill] sm:$0xff] %v1866_v29 }
 0x127   :  { %2277 = vst [vmem:[#allocation98_spill] sm:$0xff] %v1869_v38  ;;  %v1881_v38 = vld [vmem:[#allocation8 + $0x478] sm:$0xff] }
 0x138   :  { %v482_v44 = vpop.f32.mrf.mxu0  ;;  %v542_v35 = vpop.f32.mrf.mxu1 }
 0x139   :  { %v483_v48 = vadd.f32 %v482_v44, %v462_v3  ;;  %v543_v25 = vadd.f32 %v542_v35, %v463_v37  ;;  %v2303_v35 = vld [vmem:[#allocation27_spill] sm:$0xff]  ;;  %v2304_v37 = vld [vmem:[#allocation46_spill] sm:$0xff]  ;;  %v2307_v44 = vld [vmem:[#allocation28_spill] sm:$0xff] }
 0x13a   :  { %v2313_v3 = vld [vmem:[#allocation56_spill] sm:$0xff] }
 0x140   :  { %v562_v32 = vpop.f32.mrf.mxu0 }
 0x141   :  { %v563_v29 = vadd.f32 %v562_v32, %v543_v25  ;;  %v1890_v25 = vld [vmem:[#allocation8 + $0x448] sm:$0xff] }
 0x144   :  { %v502_v52 = vpop.f32.mrf.mxu2 }
 0x145   :  { %v503_v31 = vadd.f32 %v502_v52, %v483_v48  ;;  %v2309_v48 = vld [vmem:[#allocation52_spill] sm:$0xff]  ;;  %v2310_v52 = vld [vmem:[#allocation78_spill] sm:$0xff] }
 0x14e   :  { %v522_v33 = vpop.f32.mrf.mxu3  ;;  %v582_v39 = vpop.f32.mrf.mxu2 }
 0x14f   :  { %v1877_v21 = vadd.f32 %v522_v33, %v503_v31  ;;  %v1879_v7 = vadd.f32 %v582_v39, %v563_v29  ;;  %v464_v31 = vperm.slane %v458_v28, 1  ;;  %v1900_v33 = vld [vmem:[#allocation8 + $0x418] sm:$0xff]  ;;  %v1906_v28 = vld [vmem:[#allocation8 + $0x400] sm:$0xff] }
 0x150   :  { %v2305_v39 = vld [vmem:[#allocation48_spill] sm:$0xff] }
 0x151   :  { %805 = vmatmul.f32.vlgmr.msrb.gmra.mxu2 %v1877_v21  ;;  %825 = vmatmul.f32.vlgmr.msra.gmra.mxu3 %v1879_v7 }
 0x152   :  { %865 = vmatmul.f32.vlgmr.msra.gmra.mxu0 %v1877_v21  ;;  %949 = vmatpush.msrb.mxu2 %v1881_v38 }
 0x153   :  { %975 = vmatpush.msra.mxu3 %v1485_v34  ;;  %1015 = vmatpush.msra.mxu0 %v1493_v42  ;;  %v622_v34 = vpop.f32.mrf.mxu1 }
 0x154   :  { %950 = vmatpush.msrb.mxu2 %v1886_v60 }
 0x155   :  { %976 = vmatpush.msra.mxu3 %v1487_v36  ;;  %1016 = vmatpush.msra.mxu0 %v1499_v46 }
 0x156   :  { %951 = vmatpush.msrb.mxu2 %v1890_v25  ;;  %v602_v29 = vpop.f32.mrf.mxu3 }
 0x157   :  { %v603_v32 = vadd.f32 %v602_v29, %v464_v31  ;;  %977 = vmatpush.msra.mxu3 %v1490_v40  ;;  %1017 = vmatpush.msra.mxu0 %v1509_v51  ;;  %v1913_v40 = vld [vmem:[#allocation8 + $0x3e8] sm:$0xff]  ;;  %v1924_v51 = vld [vmem:[#allocation8 + $0x3b8] sm:$0xff] }
 0x158   :  { %952 = vmatpush.msrb.mxu2 %v1895_v22  ;;  %v642_v36 = vpop.f32.mrf.mxu0  ;;  %v2316_v31 = vld [vmem:[#allocation57_spill] sm:$0xff]  ;;  %v2317_v29 = vld [vmem:[#allocation60_spill] sm:$0xff] }
 0x159   :  { %v623_v42 = vadd.f32 %v622_v34, %v603_v32  ;;  %885 = vmatmul.f32.vlgmr.msra.gmra.mxu2 %v1879_v7  ;;  %978 = vmatpush.msra.mxu3 %v1495_v45  ;;  %v1920_v45 = vld [vmem:[#allocation8 + $0x3d0] sm:$0xff] }
 0x15a   :  { %945 = vmatmul.f32.vlgmr.msrb.gmra.mxu0 %v1879_v7  ;;  %953 = vmatpush.msrb.mxu2 %v1900_v33  ;;  %v2318_v32 = vld [vmem:[#allocation84_spill] sm:$0xff]  ;;  %v2319_v34 = vld [vmem:[#allocation31_spill] sm:$0xff] }
 0x15b   :  { %v1911_v46 = vadd.f32 %v642_v36, %v623_v42  ;;  %979 = vmatpush.msra.mxu3 %v1503_v49  ;;  %1018 = vmatpush.msra.mxu0 %v1518_v55  ;;  %v1930_v49 = vld [vmem:[#allocation8 + $0x3a0] sm:$0xff]  ;;  %v2321_v36 = vld [vmem:[#allocation64_spill] sm:$0xff] }
 0x15c   :  { %954 = vmatpush.msrb.mxu2 %v1906_v28  ;;  %v1954_v55 = vld [vmem:[#allocation8 + $0x340] sm:$0xff] }
 0x15d   :  { %845 = vmatmul.f32.vlgmr.msra.gmra.mxu1 %v1911_v46  ;;  %905 = vmatmul.f32.vlgmr.msrb.gmra.mxu3 %v1911_v46  ;;  %v2320_v42 = vld [vmem:[#allocation61_spill] sm:$0xff] }
 0x15e   :  { %955 = vmatpush.msrb.mxu2 %v1913_v40  ;;  %980 = vmatpush.msra.mxu3 %v1513_v53  ;;  %v1936_v53 = vld [vmem:[#allocation8 + $0x388] sm:$0xff] }
 0x15f   :  { %995 = vmatpush.msra.mxu1 %v1507_v50  ;;  %1019 = vmatpush.msra.mxu0 %v1527_v59  ;;  %v1943_v50 = vld [vmem:[#allocation8 + $0x370] sm:$0xff]  ;;  %v2278_v59 = vld [vmem:[#allocation18_spill] sm:$0xff] }
 0x160   :  { %956 = vmatpush.msrb.mxu2 %v1920_v45  ;;  %981 = vmatpush.msra.mxu3 %v1520_v57  ;;  %v1960_v57 = vld [vmem:[#allocation8 + $0x328] sm:$0xff] }
 0x161   :  { %996 = vmatpush.msra.mxu1 %v1516_v54  ;;  %1020 = vmatpush.msra.mxu0 %v1534_v62  ;;  %v1948_v54 = vld [vmem:[#allocation8 + $0x358] sm:$0xff]  ;;  %v2280_v62 = vld [vmem:[#allocation51_spill] sm:$0xff] }
 0x162   :  { %957 = vmatpush.msrb.mxu2 %v1924_v51  ;;  %982 = vmatpush.msra.mxu3 %v1529_v61  ;;  %v2279_v61 = vld [vmem:[#allocation16_spill] sm:$0xff] }
 0x163   :  { %997 = vmatpush.msra.mxu1 %v1525_v58  ;;  %1021 = vmatpush.msra.mxu0 %v1543_v2  ;;  %v1966_v58 = vld [vmem:[#allocation8 + $0x310] sm:$0xff]  ;;  %v2283_v2 = vld [vmem:[#allocation17_spill] sm:$0xff] }
 0x164   :  { %958 = vmatpush.msrb.mxu2 %v1930_v49  ;;  %983 = vmatpush.msra.mxu3 %v1536_v0  ;;  %v2281_v0 = vld [vmem:[#allocation22_spill] sm:$0xff] }
 0x165   :  { %925 = vmatmul.f32.vlgmr.msrb.gmra.mxu1 %v1877_v21  ;;  %1022 = vmatpush.msra.mxu0 %v1552_v6  ;;  %v2286_v6 = vld [vmem:[#allocation23_spill] sm:$0xff] }
 0x166   :  { %959 = vmatpush.msrb.mxu2 %v1936_v53  ;;  %984 = vmatpush.msra.mxu3 %v1546_v4  ;;  %v2284_v4 = vld [vmem:[#allocation55_spill] sm:$0xff] }
 0x167   :  { %998 = vmatpush.msra.mxu1 %v1541_v1  ;;  %1023 = vmatpush.msra.mxu0 %v1561_v11  ;;  %v2282_v1 = vld [vmem:[#allocation20_spill] sm:$0xff] }
 0x168   :  { %960 = vmatpush.msrb.mxu2 %v1943_v50  ;;  %985 = vmatpush.msra.mxu3 %v1555_v9  ;;  %v2287_v9 = vld [vmem:[#allocation19_spill] sm:$0xff]  ;;  %v2289_v11 = vld [vmem:[#allocation36_spill] sm:$0xff] }
 0x169   :  { %999 = vmatpush.msra.mxu1 %v1550_v5  ;;  %1024 = vmatpush.msra.mxu0 %v1664_v63  ;;  %v2285_v5 = vld [vmem:[#allocation25_spill] sm:$0xff] }
 0x16a   :  { %961 = vmatpush.msrb.mxu2 %v1948_v54  ;;  %986 = vmatpush.msra.mxu3 %v1564_v13  ;;  %v2290_v13 = vld [vmem:[#allocation34_spill] sm:$0xff]  ;;  %v2312_v63 = vld [vmem:[#allocation53_spill] sm:$0xff] }
 0x16b   :  { %1000 = vmatpush.msra.mxu1 %v1559_v10  ;;  %1025 = vmatpush.msra.mxu0 %v1678_v56  ;;  %v2288_v10 = vld [vmem:[#allocation58_spill] sm:$0xff]  ;;  %v2311_v56 = vld [vmem:[#allocation29_spill] sm:$0xff] }
 0x16c   :  { %962 = vmatpush.msrb.mxu2 %v1954_v55  ;;  %987 = vmatpush.msra.mxu3 %v1573_v16  ;;  %v2293_v16 = vld [vmem:[#allocation39_spill] sm:$0xff] }
 0x16d   :  { %1001 = vmatpush.msra.mxu1 %v1568_v14  ;;  %1026 = vmatpush.msra.mxu0 %v1688_v43  ;;  %v2291_v14 = vld [vmem:[#allocation21_spill] sm:$0xff]  ;;  %v2306_v43 = vld [vmem:[#allocation74_spill] sm:$0xff] }
 0x16e   :  { %963 = vmatpush.msrb.mxu2 %v1960_v57  ;;  %988 = vmatpush.msra.mxu3 %v1583_v19  ;;  %v2296_v19 = vld [vmem:[#allocation66_spill] sm:$0xff] }
 0x16f   :  { %1002 = vmatpush.msra.mxu1 %v1577_v17  ;;  %1027 = vmatpush.msra.mxu0 %v1700_v12  ;;  %v2294_v17 = vld [vmem:[#allocation38_spill] sm:$0xff] }
 0x170   :  { %964 = vmatpush.msrb.mxu2 %v1966_v58  ;;  %989 = vmatpush.msra.mxu3 %v1592_v23  ;;  %v2298_v23 = vld [vmem:[#allocation41_spill] sm:$0xff]  ;;  %v2315_v12 = vld [vmem:[#allocation30_spill] sm:$0xff] }
 0x171   :  { %965 = vmatmul.f32.vlgmr.msrb.gmra.mxu2 %v1911_v46  ;;  %1003 = vmatpush.msra.mxu1 %v1587_v20  ;;  %v2297_v20 = vld [vmem:[#allocation42_spill] sm:$0xff] }
 0x172   :  { %1035 = vmatpush.msra.mxu2 %v1570_v15  ;;  %990 = vmatpush.msra.mxu3 %v1601_v26  ;;  %v2292_v15 = vld [vmem:[#allocation62_spill] sm:$0xff]  ;;  %v2300_v26 = vld [vmem:[#allocation43_spill] sm:$0xff] }
 0x173   :  { %1004 = vmatpush.msra.mxu1 %v1596_v24  ;;  %1028 = vmatpush.msra.mxu0 %v1714_v47  ;;  %v2299_v24 = vld [vmem:[#allocation26_spill] sm:$0xff]  ;;  %v2308_v47 = vld [vmem:[#allocation49_spill] sm:$0xff] }
 0x174   :  { %1055 = vmatpush.msrb.mxu3 %v1605_v27  ;;  %1036 = vmatpush.msra.mxu2 %v1580_v18  ;;  %v2295_v18 = vld [vmem:[#allocation24_spill] sm:$0xff]  ;;  %v2301_v27 = vld [vmem:[#allocation45_spill] sm:$0xff] }
 0x175   :  { %1005 = vmatpush.msra.mxu1 %v2278_v59  ;;  %1029 = vmatpush.msra.mxu0 %v2280_v62  ;;  %v2322_v59 = vld [vmem:[#allocation87_spill] sm:$0xff]  ;;  %v2324_v62 = vld [vmem:[#allocation65_spill] sm:$0xff] }
 0x176   :  { %1056 = vmatpush.msrb.mxu3 %v1614_v30  ;;  %1037 = vmatpush.msra.mxu2 %v2279_v61  ;;  %v2302_v30 = vld [vmem:[#allocation70_spill] sm:$0xff]  ;;  %v2323_v61 = vld [vmem:[#allocation32_spill] sm:$0xff] }
 0x177   :  { %1006 = vmatpush.msra.mxu1 %v2282_v1  ;;  %1030 = vmatpush.msra.mxu0 %v2284_v4  ;;  %v2326_v1 = vld [vmem:[#allocation90_spill] sm:$0xff]  ;;  %v2328_v4 = vld [vmem:[#allocation69_spill] sm:$0xff] }
 0x178   :  { %1057 = vmatpush.msrb.mxu3 %v2281_v0  ;;  %1038 = vmatpush.msra.mxu2 %v2283_v2  ;;  %v2325_v0 = vld [vmem:[#allocation68_spill] sm:$0xff]  ;;  %v2327_v2 = vld [vmem:[#allocation33_spill] sm:$0xff] }
 0x179   :  { %1007 = vmatpush.msra.mxu1 %v2286_v6  ;;  %1095 = vmatpush.msrb.mxu0 %v2288_v10  ;;  %v2330_v6 = vld [vmem:[#allocation93_spill] sm:$0xff] }
 0x17a   :  { %1058 = vmatpush.msrb.mxu3 %v2285_v5  ;;  %1039 = vmatpush.msra.mxu2 %v2287_v9  ;;  %v2329_v5 = vld [vmem:[#allocation72_spill] sm:$0xff]  ;;  %v2331_v9 = vld [vmem:[#allocation35_spill] sm:$0xff]  ;;  %v2332_v10 = vld [vmem:[#allocation73_spill] sm:$0xff] }
 0x17b   :  { %1008 = vmatpush.msra.mxu1 %v2290_v13  ;;  %1096 = vmatpush.msrb.mxu0 %v2292_v15  ;;  %v2334_v13 = vld [vmem:[#allocation76_spill] sm:$0xff]  ;;  %v2336_v15 = vld [vmem:[#allocation95_spill] sm:$0xff] }
 0x17c   :  { %1059 = vmatpush.msrb.mxu3 %v2289_v11  ;;  %1040 = vmatpush.msra.mxu2 %v2291_v14  ;;  %v2333_v11 = vld [vmem:[#allocation37_spill] sm:$0xff] }
 0x17d   :  { %1009 = vmatpush.msra.mxu1 %v2294_v17  ;;  %1097 = vmatpush.msrb.mxu0 %v2296_v19  ;;  %v2335_v14 = vld [vmem:[#allocation77_spill] sm:$0xff]  ;;  %v2338_v17 = vld [vmem:[#allocation80_spill] sm:$0xff] }
 0x17e   :  { %1060 = vmatpush.msrb.mxu3 %v2293_v16  ;;  %1041 = vmatpush.msra.mxu2 %v2295_v18  ;;  %v2337_v16 = vld [vmem:[#allocation40_spill] sm:$0xff] }
 0x17f   :  { %1010 = vmatpush.msra.mxu1 %v2298_v23  ;;  %1098 = vmatpush.msrb.mxu0 %v2302_v30  ;;  %v2339_v18 = vld [vmem:[#allocation96_spill] sm:$0xff]  ;;  %v2342_v23 = vld [vmem:[#allocation97_spill] sm:$0xff]  ;;  %v2346_v30 = vld [vmem:[#allocation50_spill] sm:$0xff] }
 0x180   :  { %1061 = vmatpush.msrb.mxu3 %v2297_v20  ;;  %1042 = vmatpush.msra.mxu2 %v2299_v24  ;;  %v2340_v19 = vld [vmem:[#allocation44_spill] sm:$0xff]  ;;  %v2341_v20 = vld [vmem:[#allocation83_spill] sm:$0xff] }
 0x181   :  { %1075 = vmatpush.msrb.mxu1 %v2300_v26  ;;  %1099 = vmatpush.msrb.mxu0 %v2306_v43  ;;  %v2343_v24 = vld [vmem:[#allocation47_spill] sm:$0xff]  ;;  %v2344_v26 = vld [vmem:[#allocation86_spill] sm:$0xff] }
 0x182   :  { %1062 = vmatpush.msrb.mxu3 %v2301_v27  ;;  %1043 = vmatpush.msra.mxu2 %v2303_v35  ;;  %v2345_v27 = vld [vmem:[#allocation98_spill] sm:$0xff]  ;;  %v2347_v35 = vld [vmem:[#allocation89_spill] sm:$0xff]  ;;  %v2350_v43 = vld [vmem:[#allocation59_spill] sm:$0xff] }
 0x183   :  { %1076 = vmatpush.msrb.mxu1 %v2304_v37  ;;  %1100 = vmatpush.msrb.mxu0 %v2310_v52  ;;  %v2348_v37 = vld [vmem:[#allocation54_spill] sm:$0xff]  ;;  %v2354_v52 = vld [vmem:[#allocation71_spill] sm:$0xff] }
 0x184   :  { %1063 = vmatpush.msrb.mxu3 %v2305_v39  ;;  %1044 = vmatpush.msra.mxu2 %v2307_v44  ;;  %v2349_v39 = vld [vmem:[#allocation92_spill] sm:$0xff]  ;;  %v2351_v44 = vld [vmem:[#allocation94_spill] sm:$0xff] }
 0x185   :  { %1077 = vmatpush.msrb.mxu1 %v2308_v47  ;;  %1101 = vmatpush.msrb.mxu0 %v2314_v8  ;;  %v2352_v47 = vld [vmem:[#allocation63_spill] sm:$0xff]  ;;  %v2359_v8 = vld [vmem:[#allocation88_spill] sm:$0xff] }
 0x186   :  { %1064 = vmatpush.msrb.mxu3 %v2309_v48  ;;  %1045 = vmatpush.msra.mxu2 %v2311_v56  ;;  %v2353_v48 = vld [vmem:[#allocation67_spill] sm:$0xff] }
 0x187   :  { %1078 = vmatpush.msrb.mxu1 %v2312_v63  ;;  %1102 = vmatpush.msrb.mxu0 %v2318_v32  ;;  %v2355_v56 = vld [vmem:[#allocation75_spill] sm:$0xff] }
 0x188   :  { %1065 = vmatpush.msrb.mxu3 %v2313_v3  ;;  %1046 = vmatpush.msra.mxu2 %v2315_v12  ;;  %v2356_v63 = vld [vmem:[#allocation79_spill] sm:$0xff]  ;;  %v2357_v3 = vld [vmem:[#allocation82_spill] sm:$0xff] }
 0x189   :  { %1079 = vmatpush.msrb.mxu1 %v2316_v31  ;;  %1103 = vmatpush.msrb.mxu0 %v2322_v59  ;;  %v2360_v12 = vld [vmem:[#allocation91_spill] sm:$0xff] }
 0x18a   :  { %1066 = vmatpush.msrb.mxu3 %v2317_v29  ;;  %1047 = vmatpush.msra.mxu2 %v2319_v34 }
 0x18b   :  { %1080 = vmatpush.msrb.mxu1 %v2320_v42  ;;  %1104 = vmatpush.msrb.mxu0 %v2326_v1 }
 0x18c   :  { %1067 = vmatpush.msrb.mxu3 %v2321_v36  ;;  %1048 = vmatpush.msra.mxu2 %v2323_v61 }
 0x18d   :  { %1081 = vmatpush.msrb.mxu1 %v2324_v62  ;;  %1105 = vmatpush.msrb.mxu0 %v2330_v6 }
 0x18e   :  { %1068 = vmatpush.msrb.mxu3 %v2325_v0  ;;  %1049 = vmatpush.msra.mxu2 %v2327_v2 }
 0x18f   :  { %1082 = vmatpush.msrb.mxu1 %v2328_v4  ;;  %1106 = vmatpush.msrb.mxu0 %v2336_v15 }
 0x190   :  { %1069 = vmatpush.msrb.mxu3 %v2329_v5  ;;  %1050 = vmatpush.msra.mxu2 %v2331_v9 }
 0x191   :  { %1083 = vmatpush.msrb.mxu1 %v2332_v10  ;;  %1107 = vmatpush.msrb.mxu0 %v2339_v18 }
 0x192   :  { %1115 = vmatpush.msrb.mxu2 %v2333_v11  ;;  %1070 = vmatpush.msrb.mxu3 %v2334_v13 }
 0x193   :  { %1084 = vmatpush.msrb.mxu1 %v2335_v14  ;;  %1108 = vmatpush.msrb.mxu0 %v2342_v23 }
 0x194   :  { %1116 = vmatpush.msrb.mxu2 %v2337_v16 }
 0x195   :  { %1085 = vmatpush.msrb.mxu1 %v2338_v17  ;;  %1109 = vmatpush.msrb.mxu0 %v2345_v27 }
 0x196   :  { %1117 = vmatpush.msrb.mxu2 %v2340_v19 }
 0x197   :  { %1086 = vmatpush.msrb.mxu1 %v2341_v20  ;;  %1110 = vmatpush.msrb.mxu0 %v1874_v41  ;;  %v2358_v41 = vld [vmem:[#allocation85_spill] sm:$0xff] }
 0x198   :  { %1118 = vmatpush.msrb.mxu2 %v2343_v24 }
 0x199   :  { %1087 = vmatpush.msrb.mxu1 %v2344_v26 }
 0x19a   :  { %1119 = vmatpush.msrb.mxu2 %v2346_v30 }
 0x19b   :  { %1088 = vmatpush.msrb.mxu1 %v2347_v35  ;;  %v1259_v35 = vld [vmem:[#allocation10] sm:$0xff] }
 0x19c   :  { %1120 = vmatpush.msrb.mxu2 %v2348_v37  ;;  %v1189_v37 = vperm.slane %v1259_v35, 6 }
 0x19d   :  { %1089 = vmatpush.msrb.mxu1 %v2349_v39 }
 0x19e   :  { %1121 = vmatpush.msrb.mxu2 %v2350_v43 }
 0x19f   :  { %1090 = vmatpush.msrb.mxu1 %v2351_v44 }
 0x1a0   :  { %1122 = vmatpush.msrb.mxu2 %v2352_v47 }
 0x1a2   :  { %1123 = vmatpush.msrb.mxu2 %v2353_v48 }
 0x1a4   :  { %1124 = vmatpush.msrb.mxu2 %v2354_v52  ;;  %v1195_v52 = vperm.slane %v1189_v37, 2 }
 0x1a6   :  { %1125 = vmatpush.msrb.mxu2 %v2355_v56 }
 0x1a8   :  { %1126 = vmatpush.msrb.mxu2 %v2356_v63  ;;  %v1201_v63 = vperm.slane %v1259_v35, 7 }
 0x1aa   :  { %1127 = vmatpush.msrb.mxu2 %v2357_v3  ;;  %v1188_v3 = vperm.slane %v1259_v35, 2 }
 0x1ac   :  { %1128 = vmatpush.msrb.mxu2 %v2358_v41 }
 0x1ae   :  { %1129 = vmatpush.msrb.mxu2 %v2359_v8  ;;  %v1260_v8 = vld [vmem:[#allocation10 + $0x8] sm:$0xf] }
 0x1b0   :  { %1130 = vmatpush.msrb.mxu2 %v2360_v12  ;;  %v1190_v12 = vperm.slane %v1260_v8, 2 }
 0x1cf   :  { %v866_v61 = vpop.f32.mrf.mxu0 }
 0x1d4   :  { %v806_v31 = vpop.f32.mrf.mxu2  ;;  %v826_v29 = vpop.f32.mrf.mxu3 }
 0x1d5   :  { %v827_v32 = vadd.f32 %v826_v29, %v806_v31 }
 0x1da   :  { %v846_v34 = vpop.f32.mrf.mxu1 }
 0x1db   :  { %v847_v42 = vadd.f32 %v846_v34, %v827_v32  ;;  %v1207_v34 = vperm.slane %v1201_v63, 3 }
 0x1dc   :  { %v886_v36 = vpop.f32.mrf.mxu2 }
 0x1dd   :  { %v2070_v59 = vsub.f32 %v1877_v21, %v847_v42  ;;  %v887_v0 = vadd.f32 %v886_v36, %v866_v61  ;;  %v1202_v42 = vperm.slane %v1260_v8, 3  ;;  %v1194_v36 = vperm.slane %v1188_v3, 2 }
 0x1df   :  { %v972_v62 = vmul.f32 %v2070_v59, %v2070_v59 }
 0x1e0   :  { %v906_v1 = vpop.f32.mrf.mxu3 }
 0x1e1   :  { %v907_v2 = vadd.f32 %v906_v1, %v887_v0  ;;  %991 = vmatmul.f32.vlgmr.msra.gmra.mxu3 %v972_v62  ;;  %1051 = vmatmul.f32.vlgmr.msra.gmra.mxu2 %v972_v62  ;;  %v1200_v0 = vperm.slane %v1259_v35, 3  ;;  %v1196_v1 = vperm.slane %v1190_v12, 2 }
 0x1e2   :  { %1135 = vmatpush.msra.mxu3 %v1881_v38  ;;  %v926_v38 = vpop.f32.mrf.mxu1 }
 0x1e3   :  { %v2076_v4 = vsub.f32 %v1879_v7, %v907_v2  ;;  %v946_v7 = vpop.f32.mrf.mxu0 }
 0x1e4   :  { %1136 = vmatpush.msra.mxu3 %v1886_v60  ;;  %v947_v60 = vadd.f32 %v946_v7, %v926_v38  ;;  %v1208_v38 = vperm.slane %v1202_v42, 3 }
 0x1e5   :  { %v973_v21 = vmul.f32 %v2076_v4, %v2076_v4 }
 0x1e6   :  { %1137 = vmatpush.msra.mxu3 %v1890_v25 }
 0x1e7   :  { %1011 = vmatmul.f32.vlgmr.msra.gmra.mxu1 %v973_v21 }
 0x1e8   :  { %1138 = vmatpush.msra.mxu3 %v1895_v22 }
 0x1e9   :  { %1071 = vmatmul.f32.vlgmr.msrb.gmra.mxu3 %v973_v21  ;;  %1131 = vmatmul.f32.vlgmr.msrb.gmra.mxu2 %v973_v21 }
 0x1ea   :  { %1139 = vmatpush.msra.mxu3 %v1900_v33 }
 0x1ec   :  { %1140 = vmatpush.msra.mxu3 %v1906_v28 }
 0x1ee   :  { %1141 = vmatpush.msra.mxu3 %v1913_v40 }
 0x1f0   :  { %1142 = vmatpush.msra.mxu3 %v1920_v45 }
 0x1f2   :  { %1143 = vmatpush.msra.mxu3 %v1924_v51 }
 0x1f4   :  { %v966_v5 = vpop.f32.mrf.mxu2  ;;  %1144 = vmatpush.msra.mxu3 %v1930_v49 }
 0x1f5   :  { %v967_v25 = vadd.f32 %v966_v5, %v947_v60  ;;  %v1206_v60 = vperm.slane %v1200_v0, 3 }
 0x1f6   :  { %1145 = vmatpush.msra.mxu3 %v1936_v53 }
 0x1f7   :  { %v2091_v22 = vsub.f32 %v1911_v46, %v967_v25 }
 0x1f8   :  { %1146 = vmatpush.msra.mxu3 %v1943_v50 }
 0x1f9   :  { %v974_v33 = vmul.f32 %v2091_v22, %v2091_v22 }
 0x1fa   :  { %1147 = vmatpush.msra.mxu3 %v1948_v54 }
 0x1fb   :  { %1031 = vmatmul.f32.vlgmr.msra.gmra.mxu0 %v974_v33  ;;  %1091 = vmatmul.f32.vlgmr.msrb.gmra.mxu1 %v974_v33 }
 0x1fc   :  { %1148 = vmatpush.msra.mxu3 %v1954_v55 }
 0x1fe   :  { %1149 = vmatpush.msra.mxu3 %v1960_v57 }
 0x200   :  { %1150 = vmatpush.msra.mxu3 %v1966_v58 }
 0x201   :  { %1151 = vmatmul.f32.vlgmr.msra.gmra.mxu3 %v974_v33 }
 0x203   :  { %1111 = vmatmul.f32.vlgmr.msrb.gmra.mxu0 %v972_v62 }
 0x264   :  { %v992_v28 = vpop.f32.mrf.mxu3  ;;  %v1012_v46 = vpop.f32.mrf.mxu1 }
 0x265   :  { %v1052_v40 = vpop.f32.mrf.mxu2  ;;  %v993_v45 = vadd.f32 1e-05, %v992_v28 }
 0x266   :  { %v1053_v49 = vadd.f32 1e-05, %v1052_v40 }
 0x267   :  { %v1013_v53 = vadd.f32 %v1012_v46, %v993_v45 }
 0x26c   :  { %v1072_v51 = vpop.f32.mrf.mxu3 }
 0x26d   :  { %v1073_v50 = vadd.f32 %v1072_v51, %v1053_v49  ;;  %v1132_v13 = vpop.f32.mrf.mxu2 }
 0x278   :  { %v1032_v6 = vpop.f32.mrf.mxu0  ;;  %v1092_v54 = vpop.f32.mrf.mxu1 }
 0x279   :  { %v1033_v9 = vadd.f32 %v1032_v6, %v1013_v53  ;;  %v1093_v10 = vadd.f32 %v1092_v54, %v1073_v50 }
 0x27b   :  { %1253 = vrsqrt.f32 %v1033_v9  ;;  %vm1171_vm2 = vweird.f32 %v1093_v10  ;;  %vm1161_vm5 = vweird.f32 %v1033_v9 }
 0x27c   :  { %1255 = vrsqrt.f32 %v1093_v10 }
 0x280   :  { %v1112_v55 = vpop.f32.mrf.mxu0 }
 0x281   :  { %v1254_v57 = vpop.eup %1253  ;;  %v1113_v11 = vadd.f32 1e-05, %v1112_v55 }
 0x282   :  { %v1256_v58 = vpop.eup %1255  ;;  %v1156_v14 = vmul.f32 %v1254_v57, %v1033_v9  ;;  %vm1162_vm4 = vweird.f32 %v1254_v57 }
 0x283   :  { %v1166_v15 = vmul.f32 %v1256_v58, %v1093_v10  ;;  %v1133_v16 = vadd.f32 %v1132_v13, %v1113_v11  ;;  %vm1172_vm1 = vweird.f32 %v1256_v58  ;;  %vm1163_vm6 = vmor %vm1161_vm5, %vm1162_vm4 }
 0x284   :  { %v1157_v17 = vmul.f32 %v1254_v57, %v1156_v14  ;;  %v1152_v18 = vpop.f32.mrf.mxu3  ;;  %vm1173_vm3 = vmor %vm1171_vm2, %vm1172_vm1 }
 0x285   :  { %v1167_v19 = vmul.f32 %v1256_v58, %v1166_v15  ;;  %v1153_v20 = vadd.f32 %v1152_v18, %v1133_v16 }
 0x286   :  { %v1158_v23 = vmul.f32 0.5, %v1157_v17 }
 0x287   :  { %v1168_v24 = vmul.f32 0.5, %v1167_v19  ;;  %1257 = vrsqrt.f32 %v1153_v20  ;;  %vm1181_vm8 = vweird.f32 %v1153_v20 }
 0x288   :  { %v1159_v27 = vsub.f32 1.5, %v1158_v23 }
 0x289   :  { %v1169_v26 = vsub.f32 1.5, %v1168_v24 }
 0x28a   :  { %v1160_v47 = vmul.f32 %v1254_v57, %v1159_v27 }
 0x28b   :  { %v1170_v30 = vmul.f32 %v1256_v58, %v1169_v26 }
 0x28c   :  { %v1164_v31 = vsel %vm1163_vm6, %v1254_v57, %v1160_v47 }
 0x28d   :  { %v1258_v39 = vpop.eup %1257  ;;  %v1174_v43 = vsel %vm1173_vm3, %v1256_v58, %v1170_v30  ;;  %v1185_v61 = vmul.f32 %v1164_v31, %v2070_v59 }
 0x28e   :  { %v1176_v44 = vmul.f32 %v1258_v39, %v1153_v20  ;;  %v1186_v48 = vmul.f32 %v1174_v43, %v2076_v4  ;;  %vm1182_vm7 = vweird.f32 %v1258_v39 }
 0x28f   :  { %vm1183_vm9 = vmor %vm1181_vm8, %vm1182_vm7  ;;  %v1197_v7 = vmul.f32 %v1194_v36, %v1185_v61 }
 0x290   :  { %v1177_v56 = vmul.f32 %v1258_v39, %v1176_v44  ;;  %v1198_v29 = vmul.f32 %v1195_v52, %v1186_v48 }
 0x291   :  { %v1209_v59 = vadd.f32 %v1206_v60, %v1197_v7 }
 0x292   :  { %v1178_v41 = vmul.f32 0.5, %v1177_v56  ;;  %v1210_v4 = vadd.f32 %v1207_v34, %v1198_v29 }
 0x294   :  { %v1179_v32 = vsub.f32 1.5, %v1178_v41  ;;  %v1215_v25 = vrot.slane %v1210_v4, 6 }
 0x296   :  { %v1180_v62 = vmul.f32 %v1258_v39, %v1179_v32  ;;  %v1218_v46 = vsel %vm1217_vm10, %v1209_v59, %v1215_v25 }
 0x298   :  { %v1184_v2 = vsel %vm1183_vm9, %v1258_v39, %v1180_v62 }
 0x299   :  { %v1187_v21 = vmul.f32 %v1184_v2, %v2091_v22 }
 0x29b   :  { %v1199_v5 = vmul.f32 %v1196_v1, %v1187_v21 }
 0x29d   :  { %v1211_v33 = vadd.f32 %v1208_v38, %v1199_v5 }
 0x29f   :  { %v1216_v28 = vrot.slane %v1211_v33, 4 }
 0x2a1   :  { %v1220_v22 = vsel %vm1219_vm11, %v1218_v46, %v1216_v28 }
 0x2a2   :  { %1222 = vst [vmem:[#allocation11] sm:$0x3f] %v1220_v22 }
 0x2a3   :  { %1233 = dma.vmem_to_hbm [thread:$0]  %s1229_s4, 96, %s1231_s19, [#allocation4]  }
 0x2a4   :  { %1411 = dma.done.wait [#allocation4], 96  }
 0x2a5   :  { %1412 = vsyncadd [#allocation4], 4294967200 }
 0x2a6   :  { %1238 = vsyncpa [#allocation3], 1 }
 0x2a7   :  { %1239 = vsyncpa [#allocation6], 1 }
 0x2a8   :  { %1240 = vsyncpa [#allocation9], 1 }
 0x2a9   :  { %1241 = vsyncpa [#allocation4], 1 }

</bundles_post_ra>
